<compile_context>
chip_gen: v6e
topology: v6e:2x2x1
jax: 0.10.0
libtpu: 0.0.40
codegen_flags: <defaults>
</compile_context>

<pallas_src>
import math
import functools

import jax
import jax.numpy as jnp
from jax.experimental import pallas as pl
from jax.experimental.pallas import tpu as pltpu


_SQRT_2_OVER_PI = math.sqrt(2.0 / math.pi)


def _layernorm(x, gamma, beta, eps=1e-5):
    """LayerNorm with one-pass statistics (var = E[x^2] - mu^2)."""
    mu = jnp.mean(x, axis=-1, keepdims=True)
    ms = jnp.mean(x * x, axis=-1, keepdims=True)
    var = ms - mu * mu
    return (x - mu) * jax.lax.rsqrt(var + eps) * gamma + beta


def _gelu_tanh(x):
    # exact formula of the reference GELU module
    return 0.5 * x * (1.0 + jnp.tanh(_SQRT_2_OVER_PI * (x + 0.044715 * x * x * x)))


# ----------------------------------------------------------------------------
# fused transformer kernel
#   grid = (batch, layer); the (S, D) activation is carried across layers in a
#   VMEM scratch, layer weights are streamed via the index_map, and only the
#   cls row is written to HBM at the last layer.
# ----------------------------------------------------------------------------
def _transformer_kernel(
    x_ref,                                  # (1, S, D)      f32  (cls + pos already applied)
    ln1_g_ref, ln1_b_ref,                   # (1, 1, D)      f32
    wq_ref, wk_ref, wv_ref,                 # (1, H, D, Dh)  bf16 (wq pre-scaled by 1/sqrt(Dh))
    wo_ref,                                 # (1, H, Dh, D)  bf16
    bo_ref,                                 # (1, 1, D)      f32
    ln2_g_ref, ln2_b_ref,                   # (1, 1, D)      f32
    w1_ref,                                 # (1, D, F)      bf16
    b1_ref,                                 # (1, 1, F)      f32
    w2_ref,                                 # (1, F, D)      bf16
    b2_ref,                                 # (1, 1, D)      f32
    cls_out_ref,                            # (1, 1, D)      f32  output
    carry_ref,                              # (S, D)         f32  VMEM scratch (persists over layers)
    *, heads,
):
    layer = pl.program_id(1)

    @pl.when(layer == 0)
    def _():
        carry_ref[...] = x_ref[0]           # initialize the per-batch carry

    x = carry_ref[...]                      # (S, D) f32
    s_len, d_model = x.shape

    # ---------------- attention sub-block:  x + Wout(softmax(QK^T)V) + bo ----
    xn = _layernorm(x, ln1_g_ref[0], ln1_b_ref[0])
    xn_h = jnp.broadcast_to(xn.astype(jnp.bfloat16)[None], (heads, s_len, d_model))

    q = jnp.einsum('hsk,hkd->hsd', xn_h, wq_ref[0],
                   preferred_element_type=jnp.float32).astype(jnp.bfloat16)   # scale folded in
    k = jnp.einsum('hsk,hkd->hsd', xn_h, wk_ref[0],
                   preferred_element_type=jnp.float32).astype(jnp.bfloat16)
    v = jnp.einsum('hsk,hkd->hsd', xn_h, wv_ref[0],
                   preferred_element_type=jnp.float32).astype(jnp.bfloat16)

    s = jnp.einsum('hid,hjd->hij', q, k, preferred_element_type=jnp.float32)  # (H, S, S)
    s = s - jnp.max(s, axis=-1, keepdims=True)
    e = jnp.exp(s)
    p = e * pl.reciprocal(jnp.sum(e, axis=-1, keepdims=True), approx=True)

    o = jnp.einsum('hij,hjd->hid', p.astype(jnp.bfloat16), v,
                   preferred_element_type=jnp.float32)                        # (H, S, Dh)
    proj = jnp.einsum('hid,hdk->hik', o.astype(jnp.bfloat16), wo_ref[0],
                      preferred_element_type=jnp.float32)                     # (H, S, D)
    x = x + jnp.sum(proj, axis=0) + bo_ref[0]

    # ---------------- feed-forward sub-block:  x + W2(gelu(W1 x + b1)) + b2 --
    xn2 = _layernorm(x, ln2_g_ref[0], ln2_b_ref[0])
    h = jnp.dot(xn2.astype(jnp.bfloat16), w1_ref[0],
                preferred_element_type=jnp.float32) + b1_ref[0]
    h = _gelu_tanh(h)
    y = jnp.dot(h.astype(jnp.bfloat16), w2_ref[0],
                preferred_element_type=jnp.float32) + b2_ref[0]
    x = x + y

    carry_ref[...] = x

    @pl.when(layer == pl.num_programs(1) - 1)
    def _():
        cls_out_ref[0] = x[0:1, :].astype(cls_out_ref.dtype)


# ----------------------------------------------------------------------------
# wrapper
# ----------------------------------------------------------------------------
def temporal_transformer_cls_forward(x, cls_token, pos_embedding, kp):
    """Forward of Temporal_Transformer_Cls.  x: (B, N, D) f32 -> (B, D) f32."""
    B, N, D = x.shape
    S = N + 1
    depth, heads, _, dim_head = kp['wq'].shape
    mlp_dim = kp['w1'].shape[-1]

    # cls-token prepend + positional embedding (one-time JAX glue).
    cls = jnp.broadcast_to(cls_token, (B, 1, D)).astype(jnp.float32)
    seq = jnp.concatenate([cls, x.astype(jnp.float32)], axis=1) + pos_embedding[:, :S]

    lsel3 = lambda b, l: (l, 0, 0)
    lsel4 = lambda b, l: (l, 0, 0, 0)

    in_specs = [
        pl.BlockSpec((1, S, D), lambda b, l: (b, 0, 0)),          # seq
        pl.BlockSpec((1, 1, D), lsel3),                           # ln1_g
        pl.BlockSpec((1, 1, D), lsel3),                           # ln1_b
        pl.BlockSpec((1, heads, D, dim_head), lsel4),             # wq
        pl.BlockSpec((1, heads, D, dim_head), lsel4),             # wk
        pl.BlockSpec((1, heads, D, dim_head), lsel4),             # wv
        pl.BlockSpec((1, heads, dim_head, D), lsel4),             # wo
        pl.BlockSpec((1, 1, D), lsel3),                           # bo
        pl.BlockSpec((1, 1, D), lsel3),                           # ln2_g
        pl.BlockSpec((1, 1, D), lsel3),                           # ln2_b
        pl.BlockSpec((1, D, mlp_dim), lsel3),                     # w1
        pl.BlockSpec((1, 1, mlp_dim), lsel3),                     # b1
        pl.BlockSpec((1, mlp_dim, D), lsel3),                     # w2
        pl.BlockSpec((1, 1, D), lsel3),                           # b2
    ]

    out = pl.pallas_call(
        functools.partial(_transformer_kernel, heads=heads),
        out_shape=jax.ShapeDtypeStruct((B, 1, D), jnp.float32),
        grid=(B, depth),
        in_specs=in_specs,
        out_specs=pl.BlockSpec((1, 1, D), lambda b, l: (b, 0, 0)),
        scratch_shapes=[pltpu.VMEM((S, D), jnp.float32)],
        compiler_params=pltpu.CompilerParams(
            dimension_semantics=("parallel", "arbitrary")),
    )(seq,
      kp['ln1_g'], kp['ln1_b'], kp['wq'], kp['wk'], kp['wv'], kp['wo'], kp['bo'],
      kp['ln2_g'], kp['ln2_b'], kp['w1'], kp['b1'], kp['w2'], kp['b2'])

    return out[:, 0, :]


# ----------------------------------------------------------------------------
# parameters (deterministic, synthetic) and kernel-layout preparation
# ----------------------------------------------------------------------------
def init_model(key, *, num_patches, input_dim, depth, heads, dim_head, mlp_dim):
    inner = heads * dim_head
    keys = jax.random.split(key, 2 + 10 * depth)
    cls_token = jax.random.normal(keys[0], (1, 1, input_dim), jnp.float32)
    pos_embedding = jax.random.normal(keys[1], (1, num_patches + 1, input_dim), jnp.float32)

    layers = []
    ki = 2
    for _ in range(depth):
        ks = keys[ki:ki + 10]
        ki += 10
        layers.append(dict(
            ln1_g=1.0 + 0.1 * jax.random.normal(ks[0], (input_dim,), jnp.float32),
            ln1_b=0.1 * jax.random.normal(ks[1], (input_dim,), jnp.float32),
            wqkv=0.05 * jax.random.normal(ks[2], (input_dim, 3 * inner), jnp.float32),
            wout=0.05 * jax.random.normal(ks[3], (inner, input_dim), jnp.float32),
            bout=0.05 * jax.random.normal(ks[4], (input_dim,), jnp.float32),
            ln2_g=1.0 + 0.1 * jax.random.normal(ks[5], (input_dim,), jnp.float32),
            ln2_b=0.1 * jax.random.normal(ks[6], (input_dim,), jnp.float32),
            w1=0.05 * jax.random.normal(ks[7], (input_dim, mlp_dim), jnp.float32),
            b1=0.05 * jax.random.normal(ks[8], (mlp_dim,), jnp.float32),
            w2=0.05 * jax.random.normal(ks[9], (mlp_dim, input_dim), jnp.float32),
            b2=jnp.zeros((input_dim,), jnp.float32),
        ))
    return dict(cls_token=cls_token, pos_embedding=pos_embedding, layers=layers,
                heads=heads, dim_head=dim_head)


def prepare_kernel_params(model):
    """Repack parameters for the fused kernel:
       - stack along a leading `depth` axis (selected by the BlockSpec index_map)
       - split Wqkv / Wout per head (no in-kernel reshape / transpose needed)
       - fold the attention scale into Wq (one-time, offline)
       - cast matmul weights to bf16 (biases / LayerNorm params stay f32)."""
    heads, dim_head = model['heads'], model['dim_head']
    inner = heads * dim_head
    scale = dim_head ** -0.5
    dim = model['cls_token'].shape[-1]

    def per_head_in(w):  # (dim, inner) -> (heads, dim, dim_head)
        return jnp.transpose(w.reshape(dim, heads, dim_head), (1, 0, 2))

    cols = {k: [] for k in ('ln1_g', 'ln1_b', 'wq', 'wk', 'wv', 'wo', 'bo',
                            'ln2_g', 'ln2_b', 'w1', 'b1', 'w2', 'b2')}
    for lyr in model['layers']:
        wqkv = lyr['wqkv']
        cols['wq'].append(per_head_in(wqkv[:, :inner] * scale).astype(jnp.bfloat16))
        cols['wk'].append(per_head_in(wqkv[:, inner:2 * inner]).astype(jnp.bfloat16))
        cols['wv'].append(per_head_in(wqkv[:, 2 * inner:]).astype(jnp.bfloat16))
        cols['wo'].append(lyr['wout'].reshape(heads, dim_head, dim).astype(jnp.bfloat16))
        cols['bo'].append(lyr['bout'][None, :])
        cols['ln1_g'].append(lyr['ln1_g'][None, :])
        cols['ln1_b'].append(lyr['ln1_b'][None, :])
        cols['ln2_g'].append(lyr['ln2_g'][None, :])
        cols['ln2_b'].append(lyr['ln2_b'][None, :])
        cols['w1'].append(lyr['w1'].astype(jnp.bfloat16))
        cols['b1'].append(lyr['b1'][None, :])
        cols['w2'].append(lyr['w2'].astype(jnp.bfloat16))
        cols['b2'].append(lyr['b2'][None, :])

    return {k: jnp.stack(v, axis=0) for k, v in cols.items()}


# ----------------------------------------------------------------------------
# pure-JAX reference mirroring the PyTorch forward (bf16 matmul inputs to match
# the kernel's MXU precision; f32 elsewhere)
# ----------------------------------------------------------------------------
def reference_forward(x, model):
    heads, dim_head = model['heads'], model['dim_head']
    scale = dim_head ** -0.5
    B, N, D = x.shape
    S = N + 1

    def mm(a, w):
        return jnp.einsum('...k,km->...m', a.astype(jnp.bfloat16),
                          w.astype(jnp.bfloat16),
                          preferred_element_type=jnp.float32)

    cls = jnp.broadcast_to(model['cls_token'], (B, 1, D))
    z = jnp.concatenate([cls, x], axis=1) + model['pos_embedding'][:, :S]

    for lyr in model['layers']:
        zn = _layernorm(z, lyr['ln1_g'], lyr['ln1_b'])
        qkv = mm(zn, lyr['wqkv'])
        q, k, v = jnp.split(qkv, 3, axis=-1)

        def to_heads(t):
            return jnp.transpose(t.reshape(B, S, heads, dim_head), (0, 2, 1, 3))
        q, k, v = map(to_heads, (q, k, v))

        dots = jnp.einsum('bhid,bhjd->bhij', q.astype(jnp.bfloat16),
                          k.astype(jnp.bfloat16),
                          preferred_element_type=jnp.float32) * scale
        attn = jax.nn.softmax(dots, axis=-1)
        out = jnp.einsum('bhij,bhjd->bhid', attn.astype(jnp.bfloat16),
                         v.astype(jnp.bfloat16),
                         preferred_element_type=jnp.float32)
        out = jnp.transpose(out, (0, 2, 1, 3)).reshape(B, S, heads * dim_head)
        z = z + mm(out, lyr['wout']) + lyr['bout']

        zn = _layernorm(z, lyr['ln2_g'], lyr['ln2_b'])
        h = _gelu_tanh(mm(zn, lyr['w1']) + lyr['b1'])
        z = z + mm(h, lyr['w2']) + lyr['b2']

    return z[:, 0]


if __name__ == "__main__":
    # small shapes consistent with the module (D chosen lane-dense = 128)
    B, num_patches, input_dim = 2, 8, 128
    depth, heads, dim_head, mlp_dim = 2, 4, 32, 256

    key = jax.random.PRNGKey(0)
    key, xkey, mkey = jax.random.split(key, 3)
    x = jax.random.normal(xkey, (B, num_patches, input_dim), jnp.float32)

    model = init_model(mkey, num_patches=num_patches, input_dim=input_dim,
                       depth=depth, heads=heads, dim_head=dim_head, mlp_dim=mlp_dim)
    kparams = prepare_kernel_params(model)

    fwd = jax.jit(temporal_transformer_cls_forward)
    y = fwd(x, model['cls_token'], model['pos_embedding'], kparams)
    y = jax.block_until_ready(y)
    assert y.shape == (B, input_dim)

    y_ref = reference_forward(x, model)
    assert jnp.allclose(y, y_ref, atol=2e-2, rtol=2e-2), (
        f"mismatch vs reference: max abs err {jnp.max(jnp.abs(y - y_ref))}")

    print("KERNEL_OK")
</pallas_src>

<mosaic_0001>
module attributes {stable_mosaic.version = 11 : i64} {
  func.func @_transformer_kernel(%arg0: i32, %arg1: i32, %arg2: memref<1x9x128xf32, #tpu.memory_space<vmem>>, %arg3: memref<1x1x128xf32, #tpu.memory_space<vmem>>, %arg4: memref<1x1x128xf32, #tpu.memory_space<vmem>>, %arg5: memref<1x4x128x32xbf16, #tpu.memory_space<vmem>>, %arg6: memref<1x4x128x32xbf16, #tpu.memory_space<vmem>>, %arg7: memref<1x4x128x32xbf16, #tpu.memory_space<vmem>>, %arg8: memref<1x4x32x128xbf16, #tpu.memory_space<vmem>>, %arg9: memref<1x1x128xf32, #tpu.memory_space<vmem>>, %arg10: memref<1x1x128xf32, #tpu.memory_space<vmem>>, %arg11: memref<1x1x128xf32, #tpu.memory_space<vmem>>, %arg12: memref<1x128x256xbf16, #tpu.memory_space<vmem>>, %arg13: memref<1x1x256xf32, #tpu.memory_space<vmem>>, %arg14: memref<1x256x128xbf16, #tpu.memory_space<vmem>>, %arg15: memref<1x1x128xf32, #tpu.memory_space<vmem>>, %arg16: memref<1x1x128xf32, #tpu.memory_space<vmem>>, %arg17: memref<9x128xf32, #tpu.memory_space<vmem>>) attributes {dimension_semantics = [#tpu.dimension_semantics<parallel>, #tpu.dimension_semantics<arbitrary>], iteration_bounds = array<i64: 2, 2>, scalar_prefetch = 0 : i64, scratch_operands = 1 : i64, tpu.core_type = #tpu.core_type<tc>, window_params = [{transform_indices = @transform_0, window_bounds = array<i64: 1, 9, 128>}, {transform_indices = @transform_1, window_bounds = array<i64: 1, 1, 128>}, {transform_indices = @transform_2, window_bounds = array<i64: 1, 1, 128>}, {transform_indices = @transform_3, window_bounds = array<i64: 1, 4, 128, 32>}, {transform_indices = @transform_4, window_bounds = array<i64: 1, 4, 128, 32>}, {transform_indices = @transform_5, window_bounds = array<i64: 1, 4, 128, 32>}, {transform_indices = @transform_6, window_bounds = array<i64: 1, 4, 32, 128>}, {transform_indices = @transform_7, window_bounds = array<i64: 1, 1, 128>}, {transform_indices = @transform_8, window_bounds = array<i64: 1, 1, 128>}, {transform_indices = @transform_9, window_bounds = array<i64: 1, 1, 128>}, {transform_indices = @transform_10, window_bounds = array<i64: 1, 128, 256>}, {transform_indices = @transform_11, window_bounds = array<i64: 1, 1, 256>}, {transform_indices = @transform_12, window_bounds = array<i64: 1, 256, 128>}, {transform_indices = @transform_13, window_bounds = array<i64: 1, 1, 128>}, {transform_indices = @transform_14, window_bounds = array<i64: 1, 1, 128>}]} {
    %c0_i32 = arith.constant 0 : i32
    %0 = arith.cmpi eq, %arg1, %c0_i32 : i32
    %1 = arith.extui %0 : i1 to i32
    %c0_i32_0 = arith.constant 0 : i32
    %2 = arith.cmpi ne, %1, %c0_i32_0 : i32
    scf.if %2 {
      %c0_72 = arith.constant 0 : index
      %c0_73 = arith.constant 0 : index
      %c0_74 = arith.constant 0 : index
      %129 = vector.load %arg2[%c0_72, %c0_73, %c0_74] : memref<1x9x128xf32, #tpu.memory_space<vmem>>, vector<1x9x128xf32>
      %130 = vector.shape_cast %129 : vector<1x9x128xf32> to vector<9x128xf32>
      %c0_75 = arith.constant 0 : index
      %c0_76 = arith.constant 0 : index
      %131 = vector.load %arg17[%c0_75, %c0_76] : memref<9x128xf32, #tpu.memory_space<vmem>>, vector<9x128xf32>
      tpu.vector_store %arg17[%c0_75, %c0_76], %130 {strides = array<i32>} : memref<9x128xf32, #tpu.memory_space<vmem>>, vector<9x128xf32>,
    } else {
    }
    %c0 = arith.constant 0 : index
    %c0_1 = arith.constant 0 : index
    %3 = vector.load %arg17[%c0, %c0_1] : memref<9x128xf32, #tpu.memory_space<vmem>>, vector<9x128xf32>
    %c0_2 = arith.constant 0 : index
    %c0_3 = arith.constant 0 : index
    %c0_4 = arith.constant 0 : index
    %4 = vector.load %arg3[%c0_2, %c0_3, %c0_4] : memref<1x1x128xf32, #tpu.memory_space<vmem>>, vector<1x1x128xf32>
    %5 = vector.shape_cast %4 : vector<1x1x128xf32> to vector<1x128xf32>
    %c0_5 = arith.constant 0 : index
    %c0_6 = arith.constant 0 : index
    %c0_7 = arith.constant 0 : index
    %6 = vector.load %arg4[%c0_5, %c0_6, %c0_7] : memref<1x1x128xf32, #tpu.memory_space<vmem>>, vector<1x1x128xf32>
    %7 = vector.shape_cast %6 : vector<1x1x128xf32> to vector<1x128xf32>
    %cst = arith.constant dense<0.000000e+00> : vector<9xf32>
    %8 = vector.multi_reduction <add>, %3, %cst [1] : vector<9x128xf32> to vector<9xf32>
    %9 = vector.shape_cast %8 : vector<9xf32> to vector<9x1xf32>
    %cst_8 = arith.constant 1.280000e+02 : f32
    %10 = vector.broadcast %cst_8 : f32 to vector<9x1xf32>
    %11 = arith.divf %9, %10 : vector<9x1xf32>
    %12 = arith.mulf %3, %3 : vector<9x128xf32>
    %cst_9 = arith.constant dense<0.000000e+00> : vector<9xf32>
    %13 = vector.multi_reduction <add>, %12, %cst_9 [1] : vector<9x128xf32> to vector<9xf32>
    %14 = vector.shape_cast %13 : vector<9xf32> to vector<9x1xf32>
    %cst_10 = arith.constant 1.280000e+02 : f32
    %15 = vector.broadcast %cst_10 : f32 to vector<9x1xf32>
    %16 = arith.divf %14, %15 : vector<9x1xf32>
    %17 = arith.mulf %11, %11 : vector<9x1xf32>
    %18 = arith.subf %16, %17 : vector<9x1xf32>
    %19 = vector.broadcast %11 : vector<9x1xf32> to vector<9x128xf32>
    %20 = arith.subf %3, %19 : vector<9x128xf32>
    %cst_11 = arith.constant 9.99999974E-6 : f32
    %21 = vector.broadcast %cst_11 : f32 to vector<9x1xf32>
    %22 = arith.addf %18, %21 : vector<9x1xf32>
    %23 = math.rsqrt %22 : vector<9x1xf32>
    %24 = vector.broadcast %23 : vector<9x1xf32> to vector<9x128xf32>
    %25 = arith.mulf %20, %24 : vector<9x128xf32>
    %26 = vector.broadcast %5 : vector<1x128xf32> to vector<9x128xf32>
    %27 = arith.mulf %25, %26 : vector<9x128xf32>
    %28 = vector.broadcast %7 : vector<1x128xf32> to vector<9x128xf32>
    %29 = arith.addf %27, %28 : vector<9x128xf32>
    %30 = arith.truncf %29 : vector<9x128xf32> to vector<9x128xbf16>
    %31 = vector.shape_cast %30 : vector<9x128xbf16> to vector<1x9x128xbf16>
    %32 = vector.shape_cast %31 : vector<1x9x128xbf16> to vector<1x9x128xbf16>
    %33 = vector.broadcast %32 : vector<1x9x128xbf16> to vector<4x9x128xbf16>
    %c0_12 = arith.constant 0 : index
    %c0_13 = arith.constant 0 : index
    %c0_14 = arith.constant 0 : index
    %c0_15 = arith.constant 0 : index
    %34 = vector.load %arg5[%c0_12, %c0_13, %c0_14, %c0_15] : memref<1x4x128x32xbf16, #tpu.memory_space<vmem>>, vector<1x4x128x32xbf16>
    %35 = vector.shape_cast %34 : vector<1x4x128x32xbf16> to vector<4x128x32xbf16>
    "tpu.trace_start"() <{level = 10 : i32, message = "hsk,hkd->hsd"}> : () -> ()
    %cst_16 = arith.constant dense<0.000000e+00> : vector<4x9x32xf32>
    %36 = tpu.matmul %33, %35, %cst_16 {dimension_numbers = #tpu.dot_dimension_numbers<[2], [1], [1], [2], [0, 0, 0, 1, 1, 2], [0], [0]>} : vector<4x9x128xbf16>, vector<4x128x32xbf16>, vector<4x9x32xf32> -> vector<4x9x32xf32>
    "tpu.trace_stop"() : () -> ()
    %37 = arith.truncf %36 : vector<4x9x32xf32> to vector<4x9x32xbf16>
    %c0_17 = arith.constant 0 : index
    %c0_18 = arith.constant 0 : index
    %c0_19 = arith.constant 0 : index
    %c0_20 = arith.constant 0 : index
    %38 = vector.load %arg6[%c0_17, %c0_18, %c0_19, %c0_20] : memref<1x4x128x32xbf16, #tpu.memory_space<vmem>>, vector<1x4x128x32xbf16>
    %39 = vector.shape_cast %38 : vector<1x4x128x32xbf16> to vector<4x128x32xbf16>
    "tpu.trace_start"() <{level = 10 : i32, message = "hsk,hkd->hsd"}> : () -> ()
    %cst_21 = arith.constant dense<0.000000e+00> : vector<4x9x32xf32>
    %40 = tpu.matmul %33, %39, %cst_21 {dimension_numbers = #tpu.dot_dimension_numbers<[2], [1], [1], [2], [0, 0, 0, 1, 1, 2], [0], [0]>} : vector<4x9x128xbf16>, vector<4x128x32xbf16>, vector<4x9x32xf32> -> vector<4x9x32xf32>
    "tpu.trace_stop"() : () -> ()
    %41 = arith.truncf %40 : vector<4x9x32xf32> to vector<4x9x32xbf16>
    %c0_22 = arith.constant 0 : index
    %c0_23 = arith.constant 0 : index
    %c0_24 = arith.constant 0 : index
    %c0_25 = arith.constant 0 : index
    %42 = vector.load %arg7[%c0_22, %c0_23, %c0_24, %c0_25] : memref<1x4x128x32xbf16, #tpu.memory_space<vmem>>, vector<1x4x128x32xbf16>
    %43 = vector.shape_cast %42 : vector<1x4x128x32xbf16> to vector<4x128x32xbf16>
    "tpu.trace_start"() <{level = 10 : i32, message = "hsk,hkd->hsd"}> : () -> ()
    %cst_26 = arith.constant dense<0.000000e+00> : vector<4x9x32xf32>
    %44 = tpu.matmul %33, %43, %cst_26 {dimension_numbers = #tpu.dot_dimension_numbers<[2], [1], [1], [2], [0, 0, 0, 1, 1, 2], [0], [0]>} : vector<4x9x128xbf16>, vector<4x128x32xbf16>, vector<4x9x32xf32> -> vector<4x9x32xf32>
    "tpu.trace_stop"() : () -> ()
    %45 = arith.truncf %44 : vector<4x9x32xf32> to vector<4x9x32xbf16>
    "tpu.trace_start"() <{level = 10 : i32, message = "hid,hjd->hij"}> : () -> ()
    %cst_27 = arith.constant dense<0.000000e+00> : vector<4x9x9xf32>
    %46 = tpu.matmul %37, %41, %cst_27 {dimension_numbers = #tpu.dot_dimension_numbers<[2], [2], [1], [1], [0, 0, 0, 1, 1, 1], [0], [0]>} : vector<4x9x32xbf16>, vector<4x9x32xbf16>, vector<4x9x9xf32> -> vector<4x9x9xf32>
    "tpu.trace_stop"() : () -> ()
    %cst_28 = arith.constant dense<0xFF800000> : vector<4x9xf32>
    %47 = vector.multi_reduction <maximumf>, %46, %cst_28 [2] : vector<4x9x9xf32> to vector<4x9xf32>
    %48 = vector.shape_cast %47 : vector<4x9xf32> to vector<4x9x1xf32>
    %49 = vector.broadcast %48 : vector<4x9x1xf32> to vector<4x9x9xf32>
    %50 = arith.subf %46, %49 : vector<4x9x9xf32>
    %51 = math.exp %50 : vector<4x9x9xf32>
    %cst_29 = arith.constant dense<0.000000e+00> : vector<4x9xf32>
    %52 = vector.multi_reduction <add>, %51, %cst_29 [2] : vector<4x9x9xf32> to vector<4x9xf32>
    %53 = vector.shape_cast %52 : vector<4x9xf32> to vector<4x9x1xf32>
    %54 = tpu.reciprocal %53 {approx = true} : vector<4x9x1xf32> -> vector<4x9x1xf32>
    %55 = vector.broadcast %54 : vector<4x9x1xf32> to vector<4x9x9xf32>
    %56 = arith.mulf %51, %55 : vector<4x9x9xf32>
    %57 = arith.truncf %56 : vector<4x9x9xf32> to vector<4x9x9xbf16>
    "tpu.trace_start"() <{level = 10 : i32, message = "hij,hjd->hid"}> : () -> ()
    %cst_30 = arith.constant dense<0.000000e+00> : vector<4x9x32xf32>
    %58 = tpu.matmul %57, %45, %cst_30 {dimension_numbers = #tpu.dot_dimension_numbers<[2], [1], [1], [2], [0, 0, 0, 1, 1, 2], [0], [0]>} : vector<4x9x9xbf16>, vector<4x9x32xbf16>, vector<4x9x32xf32> -> vector<4x9x32xf32>
    "tpu.trace_stop"() : () -> ()
    %59 = arith.truncf %58 : vector<4x9x32xf32> to vector<4x9x32xbf16>
    %c0_31 = arith.constant 0 : index
    %c0_32 = arith.constant 0 : index
    %c0_33 = arith.constant 0 : index
    %c0_34 = arith.constant 0 : index
    %60 = vector.load %arg8[%c0_31, %c0_32, %c0_33, %c0_34] : memref<1x4x32x128xbf16, #tpu.memory_space<vmem>>, vector<1x4x32x128xbf16>
    %61 = vector.shape_cast %60 : vector<1x4x32x128xbf16> to vector<4x32x128xbf16>
    "tpu.trace_start"() <{level = 10 : i32, message = "hid,hdk->hik"}> : () -> ()
    %cst_35 = arith.constant dense<0.000000e+00> : vector<4x9x128xf32>
    %62 = tpu.matmul %59, %61, %cst_35 {dimension_numbers = #tpu.dot_dimension_numbers<[2], [1], [1], [2], [0, 0, 0, 1, 1, 2], [0], [0]>} : vector<4x9x32xbf16>, vector<4x32x128xbf16>, vector<4x9x128xf32> -> vector<4x9x128xf32>
    "tpu.trace_stop"() : () -> ()
    %cst_36 = arith.constant dense<0.000000e+00> : vector<9x128xf32>
    %63 = vector.multi_reduction <add>, %62, %cst_36 [0] : vector<4x9x128xf32> to vector<9x128xf32>
    %64 = arith.addf %3, %63 : vector<9x128xf32>
    %c0_37 = arith.constant 0 : index
    %c0_38 = arith.constant 0 : index
    %c0_39 = arith.constant 0 : index
    %65 = vector.load %arg9[%c0_37, %c0_38, %c0_39] : memref<1x1x128xf32, #tpu.memory_space<vmem>>, vector<1x1x128xf32>
    %66 = vector.shape_cast %65 : vector<1x1x128xf32> to vector<1x128xf32>
    %67 = vector.broadcast %66 : vector<1x128xf32> to vector<9x128xf32>
    %68 = arith.addf %64, %67 : vector<9x128xf32>
    %c0_40 = arith.constant 0 : index
    %c0_41 = arith.constant 0 : index
    %c0_42 = arith.constant 0 : index
    %69 = vector.load %arg10[%c0_40, %c0_41, %c0_42] : memref<1x1x128xf32, #tpu.memory_space<vmem>>, vector<1x1x128xf32>
    %70 = vector.shape_cast %69 : vector<1x1x128xf32> to vector<1x128xf32>
    %c0_43 = arith.constant 0 : index
    %c0_44 = arith.constant 0 : index
    %c0_45 = arith.constant 0 : index
    %71 = vector.load %arg11[%c0_43, %c0_44, %c0_45] : memref<1x1x128xf32, #tpu.memory_space<vmem>>, vector<1x1x128xf32>
    %72 = vector.shape_cast %71 : vector<1x1x128xf32> to vector<1x128xf32>
    %cst_46 = arith.constant dense<0.000000e+00> : vector<9xf32>
    %73 = vector.multi_reduction <add>, %68, %cst_46 [1] : vector<9x128xf32> to vector<9xf32>
    %74 = vector.shape_cast %73 : vector<9xf32> to vector<9x1xf32>
    %cst_47 = arith.constant 1.280000e+02 : f32
    %75 = vector.broadcast %cst_47 : f32 to vector<9x1xf32>
    %76 = arith.divf %74, %75 : vector<9x1xf32>
    %77 = arith.mulf %68, %68 : vector<9x128xf32>
    %cst_48 = arith.constant dense<0.000000e+00> : vector<9xf32>
    %78 = vector.multi_reduction <add>, %77, %cst_48 [1] : vector<9x128xf32> to vector<9xf32>
    %79 = vector.shape_cast %78 : vector<9xf32> to vector<9x1xf32>
    %cst_49 = arith.constant 1.280000e+02 : f32
    %80 = vector.broadcast %cst_49 : f32 to vector<9x1xf32>
    %81 = arith.divf %79, %80 : vector<9x1xf32>
    %82 = arith.mulf %76, %76 : vector<9x1xf32>
    %83 = arith.subf %81, %82 : vector<9x1xf32>
    %84 = vector.broadcast %76 : vector<9x1xf32> to vector<9x128xf32>
    %85 = arith.subf %68, %84 : vector<9x128xf32>
    %cst_50 = arith.constant 9.99999974E-6 : f32
    %86 = vector.broadcast %cst_50 : f32 to vector<9x1xf32>
    %87 = arith.addf %83, %86 : vector<9x1xf32>
    %88 = math.rsqrt %87 : vector<9x1xf32>
    %89 = vector.broadcast %88 : vector<9x1xf32> to vector<9x128xf32>
    %90 = arith.mulf %85, %89 : vector<9x128xf32>
    %91 = vector.broadcast %70 : vector<1x128xf32> to vector<9x128xf32>
    %92 = arith.mulf %90, %91 : vector<9x128xf32>
    %93 = vector.broadcast %72 : vector<1x128xf32> to vector<9x128xf32>
    %94 = arith.addf %92, %93 : vector<9x128xf32>
    %95 = arith.truncf %94 : vector<9x128xf32> to vector<9x128xbf16>
    %c0_51 = arith.constant 0 : index
    %c0_52 = arith.constant 0 : index
    %c0_53 = arith.constant 0 : index
    %96 = vector.load %arg12[%c0_51, %c0_52, %c0_53] : memref<1x128x256xbf16, #tpu.memory_space<vmem>>, vector<1x128x256xbf16>
    %97 = vector.shape_cast %96 : vector<1x128x256xbf16> to vector<128x256xbf16>
    %cst_54 = arith.constant dense<0.000000e+00> : vector<9x256xf32>
    %98 = tpu.matmul %95, %97, %cst_54 {dimension_numbers = #tpu.dot_dimension_numbers<[1], [0], [0], [1], [0, 0, 1, 1], [], []>} : vector<9x128xbf16>, vector<128x256xbf16>, vector<9x256xf32> -> vector<9x256xf32>
    %c0_55 = arith.constant 0 : index
    %c0_56 = arith.constant 0 : index
    %c0_57 = arith.constant 0 : index
    %99 = vector.load %arg13[%c0_55, %c0_56, %c0_57] : memref<1x1x256xf32, #tpu.memory_space<vmem>>, vector<1x1x256xf32>
    %100 = vector.shape_cast %99 : vector<1x1x256xf32> to vector<1x256xf32>
    %101 = vector.broadcast %100 : vector<1x256xf32> to vector<9x256xf32>
    %102 = arith.addf %98, %101 : vector<9x256xf32>
    %cst_58 = arith.constant 5.000000e-01 : f32
    %103 = vector.broadcast %cst_58 : f32 to vector<9x256xf32>
    %104 = arith.mulf %103, %102 : vector<9x256xf32>
    %cst_59 = arith.constant 4.471500e-02 : f32
    %105 = vector.broadcast %cst_59 : f32 to vector<9x256xf32>
    %106 = arith.mulf %105, %102 : vector<9x256xf32>
    %107 = arith.mulf %106, %102 : vector<9x256xf32>
    %108 = arith.mulf %107, %102 : vector<9x256xf32>
    %109 = arith.addf %102, %108 : vector<9x256xf32>
    %cst_60 = arith.constant 0.797884583 : f32
    %110 = vector.broadcast %cst_60 : f32 to vector<9x256xf32>
    %111 = arith.mulf %110, %109 : vector<9x256xf32>
    %112 = math.tanh %111 : vector<9x256xf32>
    %cst_61 = arith.constant 1.000000e+00 : f32
    %113 = vector.broadcast %cst_61 : f32 to vector<9x256xf32>
    %114 = arith.addf %113, %112 : vector<9x256xf32>
    %115 = arith.mulf %104, %114 : vector<9x256xf32>
    %116 = arith.truncf %115 : vector<9x256xf32> to vector<9x256xbf16>
    %c0_62 = arith.constant 0 : index
    %c0_63 = arith.constant 0 : index
    %c0_64 = arith.constant 0 : index
    %117 = vector.load %arg14[%c0_62, %c0_63, %c0_64] : memref<1x256x128xbf16, #tpu.memory_space<vmem>>, vector<1x256x128xbf16>
    %118 = vector.shape_cast %117 : vector<1x256x128xbf16> to vector<256x128xbf16>
    %cst_65 = arith.constant dense<0.000000e+00> : vector<9x128xf32>
    %119 = tpu.matmul %116, %118, %cst_65 {dimension_numbers = #tpu.dot_dimension_numbers<[1], [0], [0], [1], [0, 0, 1, 1], [], []>} : vector<9x256xbf16>, vector<256x128xbf16>, vector<9x128xf32> -> vector<9x128xf32>
    %c0_66 = arith.constant 0 : index
    %c0_67 = arith.constant 0 : index
    %c0_68 = arith.constant 0 : index
    %120 = vector.load %arg15[%c0_66, %c0_67, %c0_68] : memref<1x1x128xf32, #tpu.memory_space<vmem>>, vector<1x1x128xf32>
    %121 = vector.shape_cast %120 : vector<1x1x128xf32> to vector<1x128xf32>
    %122 = vector.broadcast %121 : vector<1x128xf32> to vector<9x128xf32>
    %123 = arith.addf %119, %122 : vector<9x128xf32>
    %124 = arith.addf %68, %123 : vector<9x128xf32>
    %c0_69 = arith.constant 0 : index
    %c0_70 = arith.constant 0 : index
    %125 = vector.load %arg17[%c0_69, %c0_70] : memref<9x128xf32, #tpu.memory_space<vmem>>, vector<9x128xf32>
    tpu.vector_store %arg17[%c0_69, %c0_70], %124 {strides = array<i32>} : memref<9x128xf32, #tpu.memory_space<vmem>>, vector<9x128xf32>,
    %c1_i32 = arith.constant 1 : i32
    %126 = arith.cmpi eq, %arg1, %c1_i32 : i32
    %127 = arith.extui %126 : i1 to i32
    %c0_i32_71 = arith.constant 0 : i32
    %128 = arith.cmpi ne, %127, %c0_i32_71 : i32
    scf.if %128 {
      %129 = vector.extract_strided_slice %124 {offsets = [0, 0], sizes = [1, 128], strides = [1, 1]} : vector<9x128xf32> to vector<1x128xf32>
      %c0_72 = arith.constant 0 : index
      %c0_73 = arith.constant 0 : index
      %c0_74 = arith.constant 0 : index
      %130 = vector.load %arg16[%c0_72, %c0_73, %c0_74] : memref<1x1x128xf32, #tpu.memory_space<vmem>>, vector<1x1x128xf32>
      %131 = vector.shape_cast %130 : vector<1x1x128xf32> to vector<1x128xf32>
      %132 = vector.shape_cast %129 : vector<1x128xf32> to vector<1x1x128xf32>
      tpu.vector_store %arg16[%c0_72, %c0_73, %c0_74], %132 {strides = array<i32>} : memref<1x1x128xf32, #tpu.memory_space<vmem>>, vector<1x1x128xf32>,
    } else {
    }
    return
  }
  func.func @transform_0(%arg0: i32, %arg1: i32) -> (i32, i32, i32) {
    %c0_i32 = arith.constant 0 : i32
    %c0_i32_0 = arith.constant 0 : i32
    %c0_i32_1 = arith.constant 0 : i32
    return %arg0, %c0_i32, %c0_i32_0 : i32, i32, i32
  }
  func.func @transform_1(%arg0: i32, %arg1: i32) -> (i32, i32, i32) {
    %c0_i32 = arith.constant 0 : i32
    %c0_i32_0 = arith.constant 0 : i32
    %c0_i32_1 = arith.constant 0 : i32
    return %arg1, %c0_i32, %c0_i32_0 : i32, i32, i32
  }
  func.func @transform_2(%arg0: i32, %arg1: i32) -> (i32, i32, i32) {
    %c0_i32 = arith.constant 0 : i32
    %c0_i32_0 = arith.constant 0 : i32
    %c0_i32_1 = arith.constant 0 : i32
    return %arg1, %c0_i32, %c0_i32_0 : i32, i32, i32
  }
  func.func @transform_3(%arg0: i32, %arg1: i32) -> (i32, i32, i32, i32) {
    %c0_i32 = arith.constant 0 : i32
    %c0_i32_0 = arith.constant 0 : i32
    %c0_i32_1 = arith.constant 0 : i32
    %c0_i32_2 = arith.constant 0 : i32
    return %arg1, %c0_i32, %c0_i32_0, %c0_i32_1 : i32, i32, i32, i32
  }
  func.func @transform_4(%arg0: i32, %arg1: i32) -> (i32, i32, i32, i32) {
    %c0_i32 = arith.constant 0 : i32
    %c0_i32_0 = arith.constant 0 : i32
    %c0_i32_1 = arith.constant 0 : i32
    %c0_i32_2 = arith.constant 0 : i32
    return %arg1, %c0_i32, %c0_i32_0, %c0_i32_1 : i32, i32, i32, i32
  }
  func.func @transform_5(%arg0: i32, %arg1: i32) -> (i32, i32, i32, i32) {
    %c0_i32 = arith.constant 0 : i32
    %c0_i32_0 = arith.constant 0 : i32
    %c0_i32_1 = arith.constant 0 : i32
    %c0_i32_2 = arith.constant 0 : i32
    return %arg1, %c0_i32, %c0_i32_0, %c0_i32_1 : i32, i32, i32, i32
  }
  func.func @transform_6(%arg0: i32, %arg1: i32) -> (i32, i32, i32, i32) {
    %c0_i32 = arith.constant 0 : i32
    %c0_i32_0 = arith.constant 0 : i32
    %c0_i32_1 = arith.constant 0 : i32
    %c0_i32_2 = arith.constant 0 : i32
    return %arg1, %c0_i32, %c0_i32_0, %c0_i32_1 : i32, i32, i32, i32
  }
  func.func @transform_7(%arg0: i32, %arg1: i32) -> (i32, i32, i32) {
    %c0_i32 = arith.constant 0 : i32
    %c0_i32_0 = arith.constant 0 : i32
    %c0_i32_1 = arith.constant 0 : i32
    return %arg1, %c0_i32, %c0_i32_0 : i32, i32, i32
  }
  func.func @transform_8(%arg0: i32, %arg1: i32) -> (i32, i32, i32) {
    %c0_i32 = arith.constant 0 : i32
    %c0_i32_0 = arith.constant 0 : i32
    %c0_i32_1 = arith.constant 0 : i32
    return %arg1, %c0_i32, %c0_i32_0 : i32, i32, i32
  }
  func.func @transform_9(%arg0: i32, %arg1: i32) -> (i32, i32, i32) {
    %c0_i32 = arith.constant 0 : i32
    %c0_i32_0 = arith.constant 0 : i32
    %c0_i32_1 = arith.constant 0 : i32
    return %arg1, %c0_i32, %c0_i32_0 : i32, i32, i32
  }
  func.func @transform_10(%arg0: i32, %arg1: i32) -> (i32, i32, i32) {
    %c0_i32 = arith.constant 0 : i32
    %c0_i32_0 = arith.constant 0 : i32
    %c0_i32_1 = arith.constant 0 : i32
    return %arg1, %c0_i32, %c0_i32_0 : i32, i32, i32
  }
  func.func @transform_11(%arg0: i32, %arg1: i32) -> (i32, i32, i32) {
    %c0_i32 = arith.constant 0 : i32
    %c0_i32_0 = arith.constant 0 : i32
    %c0_i32_1 = arith.constant 0 : i32
    return %arg1, %c0_i32, %c0_i32_0 : i32, i32, i32
  }
  func.func @transform_12(%arg0: i32, %arg1: i32) -> (i32, i32, i32) {
    %c0_i32 = arith.constant 0 : i32
    %c0_i32_0 = arith.constant 0 : i32
    %c0_i32_1 = arith.constant 0 : i32
    return %arg1, %c0_i32, %c0_i32_0 : i32, i32, i32
  }
  func.func @transform_13(%arg0: i32, %arg1: i32) -> (i32, i32, i32) {
    %c0_i32 = arith.constant 0 : i32
    %c0_i32_0 = arith.constant 0 : i32
    %c0_i32_1 = arith.constant 0 : i32
    return %arg1, %c0_i32, %c0_i32_0 : i32, i32, i32
  }
  func.func @transform_14(%arg0: i32, %arg1: i32) -> (i32, i32, i32) {
    %c0_i32 = arith.constant 0 : i32
    %c0_i32_0 = arith.constant 0 : i32
    %c0_i32_1 = arith.constant 0 : i32
    return %arg0, %c0_i32, %c0_i32_0 : i32, i32, i32
  }
}

</mosaic_0001>

<bundles_post_ra>
// kernel: temporal_transformer_cls_forward.1
= control target key start
LH: loop header
LB: loop body
LE: loop exit
PB: predicated region body
PF: predicated region fallthrough
CT: control target
= control target key end

     0   :  { %s5124_s0 = inlined_call_operand.vmem [shape: f32[2,9,128], index: 0, kind: input, shape index: {}]   ;;  %s5125_s1 = inlined_call_operand.vmem [shape: f32[2,1,128], index: 1, kind: input, shape index: {}]   ;;  %s5126_s2 = inlined_call_operand.vmem [shape: f32[2,1,128], index: 2, kind: input, shape index: {}]   ;;  %s5127_s3 = inlined_call_operand.vmem [shape: bf16[2,4,128,32], index: 3, kind: input, shape index: {}]   ;;  %s5128_s4 = inlined_call_operand.vmem [shape: bf16[2,4,128,32], index: 4, kind: input, shape index: {}]   ;;  %s5129_s5 = inlined_call_operand.vmem [shape: bf16[2,4,128,32], index: 5, kind: input, shape index: {}]   ;;  %s5130_s6 = inlined_call_operand.vmem [shape: bf16[2,4,32,128], index: 6, kind: input, shape index: {}]   ;;  %s5131_s7 = inlined_call_operand.vmem [shape: f32[2,1,128], index: 7, kind: input, shape index: {}]   ;;  %s5132_s8 = inlined_call_operand.vmem [shape: f32[2,1,128], index: 8, kind: input, shape index: {}]   ;;  %s5133_s9 = inlined_call_operand.vmem [shape: f32[2,1,128], index: 9, kind: input, shape index: {}]   ;;  %s5134_s10 = inlined_call_operand.vmem [shape: bf16[2,128,256], index: 10, kind: input, shape index: {}]   ;;  %s5135_s11 = inlined_call_operand.vmem [shape: f32[2,1,256], index: 11, kind: input, shape index: {}]   ;;  %s5136_s12 = inlined_call_operand.vmem [shape: bf16[2,256,128], index: 12, kind: input, shape index: {}]   ;;  %s5137_s13 = inlined_call_operand.vmem [shape: f32[2,1,128], index: 13, kind: input, shape index: {}]   ;;  %s5138_s14 = inlined_call_operand.hbm [shape: f32[2,1,128], index: 14, kind: output, shape index: {}]  }
   0x1   :  { %5153 = sst [smem:[#allocation19_spill]] %s5124_s0 }
   0x2   :  { %5154 = sst [smem:[#allocation20_spill]] %s5127_s3 }
   0x3   :  { %5155 = sst [smem:[#allocation21_spill]] %s5128_s4 }
   0x4   :  { %5156 = sst [smem:[#allocation22_spill]] %s5129_s5 }
   0x5   :  { %5157 = sst [smem:[#allocation23_spill]] %s5130_s6 }
   0x6   :  { %5158 = sst [smem:[#allocation24_spill]] %s5137_s13 }
   0x7   :  { %5159 = sst [smem:[#allocation25_spill]] %s5138_s14 }
   0x8   :  { %19 = vsyncpa [#allocation4], 0 }
   0x9   :  { %21 = vsyncpa [#allocation4 + $0x1], 0  ;;  %s4515_s29 = smov 0   ;;  %s4517_s30 = smov 0  }
   0xa   :  { %s4519_s15 = smov 0   ;;  %s4521_s16 = smov 0  }
   0xb   :  { %s4523_s17 = smov 0   ;;  %s4525_s18 = smov 0  }
   0xc   :  { %s4527_s19 = smov 0   ;;  %s4529_s20 = smov 0  }
   0xd LB: > { %5160 = sst [smem:[#allocation6_spill]] %s4405_s29  ;;  %s3408_s21 = sadd.s32 4294967295, %s4433_s20   ;;  %s4433_s20 = sphi %s4529_s20, %s27_s20   ;;  %s4429_s19 = sphi %s4527_s19, %s5203_s19   ;;  %s4425_s18 = sphi %s4525_s18, %s5202_s18   ;;  %s4421_s17 = sphi %s4523_s17, %s5201_s17   ;;  %s4417_s16 = sphi %s4521_s16, %s5200_s16   ;;  %s4413_s15 = sphi %s4519_s15, %s5199_s15   ;;  %s4409_s30 = sphi %s4517_s30, %s5205_s30   ;;  %s4405_s29 = sphi %s4515_s29, %s5204_s29  }
   0xe   : > { %5161 = sst [smem:[#allocation7_spill]] %s4413_s15  ;;  %s3409_s22 = sadd.s32 4294967294, %s4433_s20  }
   0xf   : > { %5162 = sst [smem:[#allocation8_spill]] %s4417_s16  ;;  %s36_s23 = sadd.s32 1, %s4425_s18 }
  0x10   : > { %5163 = sst [smem:[#allocation9_spill]] %s4421_s17  ;;  %p37_p0 = scmp.ge.s32.totalorder %s36_s23, 2 }
  0x11   : > { %5164 = sst [smem:[#allocation10_spill]] %s4425_s18  ;;  %s39_s24 = sadd.s32 1, %s4429_s19 }
  0x12   : > { %5165 = sst [smem:[#allocation11_spill]] %s4429_s19  ;;  %p420_p1 = scmp.ne.s32.totalorder %s4413_s15, %s4409_s30 }
  0x13   : > { %5166 = sst [smem:[#allocation12_spill]] %s4433_s20  ;;  %p421_p2 = scmp.eq.s32.totalorder %s3408_s21, 3 }
  0x14   : > { %s5207_s23 = smov (%p37_p0, %s36_s23), 0  ;;  %s5209_s24 = smov (!%p37_p0, %s39_s24), %s4429_s19 }
  0x15   : > { %5167 = sst [smem:[#allocation13_spill]] %s5207_s23  ;;  %p4564_p3 = por %p421_p2, %p420_p1 }
  0x16   : > { %p426_p4 = scmp.ne.s32.totalorder %s4409_s30, %s4405_s29  ;;  %p41_p5 = scmp.ge.s32.totalorder %s5209_s24, 2 }
  0x17   : > { %s5168_s25 = scalar_select %p4564_p3, 1, 0 }
  0x18   : > { %p427_p6 = scmp.eq.s32.totalorder %s3409_s22, 3  ;;  %p3412_p7 = scmp.ge.s32.totalorder %s4433_s20, 1 }
  0x19   : > { %5169 = sst [smem:[#allocation14_spill]] %s5168_s25  ;;  %p544_p8 = scmp.lt.s32.totalorder %s4433_s20, 5 }
  0x1a   : > { %s5211_s24 = smov (%p41_p5, %s5209_s24), 0  ;;  %p4574_p9 = por %p427_p6, %p426_p4 }
  0x1b   : > { %5170 = sst [smem:[#allocation15_spill]] %s5211_s24  ;;  %p545_p10 = pnand %p3412_p7, %p544_p8 }
  0x1c   : > { %s5171_s26 = scalar_select %p4574_p9, 1, 0 }
  0x1d   : > { %s407_s27 = ssub.s32 %s4429_s19, %s5211_s24  ;;  %s410_s28 = sadd.s32 1, %s4413_s15 }
  0x1e   : > { %5172 = sst [smem:[#allocation16_spill]] %s5171_s26  ;;  %p408_p11 = scmp.eq.s32.totalorder %s407_s27, 0 }
  0x1f   : > { %548 = sbr.rel (%p545_p10) target bundleno = 2104 (0x838), region = 76 }
  0x20   : > { %s4582_s21 = scalar_select %p408_p11, %s4413_s15, %s410_s28  }
  0x22   : > { %5173 = sst [smem:[#allocation17_spill]] %s4582_s21 }
  0x24   : > { %p641_p12 = scmp.lt.s32.totalorder %s4421_s17, 1  ;;  %p646_p13 = scmp.lt.s32.totalorder %s4417_s16, 1 }
  0x25   : > { %s5174_s0 = sld [smem:[#allocation19_spill]]  ;;  %s5181_s13 = sand.u32 1, %s4409_s30  }
  0x26   : > { %s642_s23 = scalar_select %p641_p12, %s4421_s17, 1 }
  0x27   : > { %s4589_s18 = scalar_select %p646_p13, %s4417_s16, 1 }
  0x28   : > { %s3587_s27 = sshll.u32 %s642_s23, 4  ;;  %s5175_s3 = sld [smem:[#allocation20_spill]] }
  0x29   : > { %s3588_s14 = sshll.u32 %s4589_s18, 8  ;;  %s5176_s4 = sld [smem:[#allocation21_spill]] }
  0x2a   : > { %s5177_s5 = sld [smem:[#allocation22_spill]]  ;;  %s3591_s29 = sshll.u32 %s4589_s18, 6 }
  0x2b   : > { %s645_s19 = scalar_lea.vmem %s5174_s0, %s3587_s27  ;;  %s5179_s6 = sld [smem:[#allocation23_spill]] }
  0x2c   : > { %s3425_s21 = sshll.u32 %s4589_s18, 1  ;;  %s5180_s23 = sld [smem:[#allocation24_spill]] }
  0x2d   : > { %s4646_s15 = scalar_lea.vmem %s5135_s11, %s3425_s21 }
  0x2e   : > { %s4606_s16 = scalar_lea.vmem %s5175_s3, %s3588_s14 }
  0x2f   : > { %s4611_s24 = scalar_lea.vmem %s5176_s4, %s3588_s14 }
  0x30   : > { %s4616_s22 = scalar_lea.vmem %s5177_s5, %s3588_s14  ;;  %s3592_s14 = sshll.u32 %s4589_s18, 7 }
  0x31   : > { %5178 = sst [smem:[#allocation18_spill]] %s4616_s22  ;;  %s4622_s20 = scalar_lea.vmem %s5179_s6, %s3591_s29 }
  0x32   : > { %s4641_s26 = scalar_lea.vmem %s5134_s10, %s3592_s14  ;;  %s4651_s0 = scalar_lea.vmem %s5136_s12, %s3592_s14 }
  0x33   : > { %s697_s27 = scalar_lea.vmem %s5180_s23, %s4589_s18  ;;  %s4659_s6 = scalar_lea.vmem [#allocation3], %s5181_s13 }
  0x34   : > { %s5182_s5 = sld [smem:[#allocation8_spill]] }
  0x3a   : > { %p3428_p0 = scmp.ne.s32.totalorder %s5182_s5, 0 }
  0x3c   : > { %702 = sbr.rel (%p3428_p0) target bundleno = 67 (0x43), region = 80 }
  0x41   : > { %v703_v0 = vld [vmem:[%s645_s19] sm:$0xff]  ;;  %v704_v1 = vld [vmem:[%s645_s19 + $0x8] sm:$0x1] }
  0x42   : > { %705 = vst [vmem:[#allocation2] sm:$0xff] %v703_v0  ;;  %706 = vst [vmem:[#allocation2 + $0x8] sm:$0x1] %v704_v1 }
  0x43 PF: > { %vm713_vm0 = vcmask 1040384   ;;  %v4147_v8 = vld [vmem:[%s4606_s16 + $0x38] sm:$0xff]   ;;  %v4435_v10 = vmov 0.0   ;;  %v4149_v11 = vld [vmem:[%s4606_s16 + $0x30] sm:$0xff]   ;;  %v4151_v13 = vld [vmem:[%s4606_s16 + $0x28] sm:$0xff]   ;;  %vm4436_vm1 = vmmov 0   ;;  %s5183_s25 = scalar_lea.vmem %s5125_s1, %s4589_s18  ;;  %s5184_s21 = scalar_lea.vmem %s5126_s2, %s4589_s18 }
  0x44   : > { %v4148_v9 = vld [vmem:[%s4606_s16 + $0x78] sm:$0xff]   ;;  %3752 = vmatprep.subr.bf16.mxu0 %v4435_v10  ;;  %3772 = vmatprep.subr.bf16.mxu1 %v4435_v10  ;;  %v4150_v12 = vld [vmem:[%s4606_s16 + $0x70] sm:$0xff]   ;;  %v4152_v14 = vld [vmem:[%s4606_s16 + $0x68] sm:$0xff]   ;;  %vm2030_vm2 = vcmask 261120   ;;  %vm2316_vm3 = vcmask 1043456   ;;  %vm2317_vm4 = vcmask 1044480   ;;  %s5186_s29 = scalar_lea.vmem %s5131_s7, %s4589_s18  ;;  %s5187_s17 = scalar_lea.vmem %s5132_s8, %s4589_s18 }
  0x45   : > { %3753 = vmatpush3.bf16.msra.mxu0 %v4147_v8  ;;  %3773 = vmatpush3.bf16.msra.mxu1 %v4148_v9  ;;  %v4153_v15 = vld [vmem:[%s4606_s16 + $0x20] sm:$0xff]   ;;  %v4155_v17 = vld [vmem:[%s4606_s16 + $0x18] sm:$0xff]   ;;  %v4157_v19 = vld [vmem:[%s4606_s16 + $0x10] sm:$0xff]   ;;  %vm2219_vm5 = vcmask 72704   ;;  %vm2223_vm6 = vcmask 65536   ;;  %s5188_s23 = scalar_lea.vmem %s5133_s9, %s4589_s18  ;;  %s5190_s19 = sld [smem:[#allocation8_spill]] }
  0x46   : > { %3754 = vmatprep.subr.bf16.mxu0 %v4435_v10  ;;  %3774 = vmatprep.subr.bf16.mxu1 %v4435_v10  ;;  %v4154_v16 = vld [vmem:[%s4606_s16 + $0x60] sm:$0xff]   ;;  %v4156_v18 = vld [vmem:[%s4606_s16 + $0x58] sm:$0xff]   ;;  %v4158_v20 = vld [vmem:[%s4606_s16 + $0x50] sm:$0xff]  }
  0x47   : > { %v4159_v21 = vld [vmem:[%s4606_s16 + $0x8] sm:$0xff]   ;;  %v4161_v23 = vld [vmem:[%s4606_s16] sm:$0xff]   ;;  %3768 = vmatprep.mubr.msk.bf16.mxu0 %vm4436_vm1, %v4435_v10  ;;  %3788 = vmatprep.mubr.msk.bf16.mxu1 %vm4436_vm1, %v4435_v10  ;;  %v4163_v51 = vld [vmem:[%s4606_s16 + $0xb8] sm:$0xff]  }
  0x48   : > { %v4160_v22 = vld [vmem:[%s4606_s16 + $0x48] sm:$0xff]   ;;  %v4162_v24 = vld [vmem:[%s4606_s16 + $0x40] sm:$0xff]   ;;  %v4164_v52 = vld [vmem:[%s4606_s16 + $0xf8] sm:$0xff]  }
  0x49   : > { %v4662_v2 = vld [vmem:[#allocation2] sm:$0xff]  ;;  %v4664_v3 = vld [vmem:[#allocation2 + $0x8] sm:$0x1]  ;;  %3755 = vmatpush3.bf16.msra.mxu0 %v4149_v11  ;;  %3775 = vmatpush3.bf16.msra.mxu1 %v4150_v12  ;;  %v4165_v54 = vld [vmem:[%s4606_s16 + $0xb0] sm:$0xff]  }
  0x4a   : > { %711 = vadd.xlane.f32.xlu0 %v4662_v2  ;;  %v720_v4 = vmul.f32 %v4662_v2, %v4662_v2  ;;  %v714_v5 = vsel %vm713_vm0, %v4664_v3, 0.0  ;;  %v721_v6 = vmul.f32 %v4664_v3, %v4664_v3  ;;  %3756 = vmatprep.subr.bf16.mxu0 %v4435_v10  ;;  %v3429_v42 = vld [vmem:[%s5183_s25] ss:$0 sm:$0xff]  ;;  %v4166_v55 = vld [vmem:[%s4606_s16 + $0xf0] sm:$0xff]   ;;  %v4167_v56 = vld [vmem:[%s4606_s16 + $0xa8] sm:$0xff]  }
  0x4b   : > { %3776 = vmatprep.subr.bf16.mxu1 %v4435_v10  ;;  %v3430_v47 = vld [vmem:[%s5184_s21] ss:$0 sm:$0xff]  ;;  %v4168_v57 = vld [vmem:[%s4606_s16 + $0xe8] sm:$0xff]   ;;  %v4171_v60 = vld [vmem:[%s4606_s16 + $0x98] sm:$0xff]   ;;  %p3583_p1 = scmp.ne.s32.totalorder %s5190_s19, 1 }
  0x4c   : > { %722 = vadd.xlane.f32.xlu1 %v720_v4  ;;  %v724_v7 = vsel %vm713_vm0, %v721_v6, 0.0  ;;  %v4169_v58 = vld [vmem:[%s4606_s16 + $0xa0] sm:$0xff]   ;;  %v4172_v61 = vld [vmem:[%s4606_s16 + $0xd8] sm:$0xff]   ;;  %v4173_v62 = vld [vmem:[%s4606_s16 + $0x90] sm:$0xff]  }
  0x4d   : > { %3757 = vmatpush3.bf16.msra.mxu0 %v4151_v13  ;;  %3777 = vmatpush3.bf16.msra.mxu1 %v4152_v14  ;;  %v4170_v59 = vld [vmem:[%s4606_s16 + $0xe0] sm:$0xff]   ;;  %v4174_v63 = vld [vmem:[%s4606_s16 + $0xd0] sm:$0xff]   ;;  %v4175_v0 = vld [vmem:[%s4606_s16 + $0x88] sm:$0xff]  }
  0x4e   : > { %715 = vadd.xlane.f32.xlu0 %v714_v5  ;;  %3758 = vmatprep.subr.bf16.mxu0 %v4435_v10  ;;  %v4176_v1 = vld [vmem:[%s4606_s16 + $0xc8] sm:$0xff]   ;;  %v4179_v4 = vld [vmem:[%s4611_s24 + $0x38] sm:$0xff]   ;;  %v4181_v6 = vld [vmem:[%s4611_s24 + $0x30] sm:$0xff]  }
  0x4f   : > { %3778 = vmatprep.subr.bf16.mxu1 %v4435_v10  ;;  %v4180_v5 = vld [vmem:[%s4611_s24 + $0x78] sm:$0xff]   ;;  %v4183_v8 = vld [vmem:[%s4611_s24 + $0x28] sm:$0xff]   ;;  %v4185_v11 = vld [vmem:[%s4611_s24 + $0x20] sm:$0xff]  }
  0x50   : > { %725 = vadd.xlane.f32.xlu1 %v724_v7  ;;  %v4182_v7 = vld [vmem:[%s4611_s24 + $0x70] sm:$0xff]   ;;  %v4184_v9 = vld [vmem:[%s4611_s24 + $0x68] sm:$0xff]   ;;  %v4186_v12 = vld [vmem:[%s4611_s24 + $0x60] sm:$0xff]  }
  0x51   : > { %3759 = vmatpush3.bf16.msra.mxu0 %v4153_v15  ;;  %3779 = vmatpush3.bf16.msra.mxu1 %v4154_v16  ;;  %v4187_v13 = vld [vmem:[%s4611_s24 + $0x18] sm:$0xff]   ;;  %v4189_v15 = vld [vmem:[%s4611_s24 + $0x10] sm:$0xff]  }
  0x52   : > { %3760 = vmatprep.subr.bf16.mxu0 %v4435_v10  ;;  %3780 = vmatprep.subr.bf16.mxu1 %v4435_v10  ;;  %v4188_v14 = vld [vmem:[%s4611_s24 + $0x58] sm:$0xff]   ;;  %v4190_v16 = vld [vmem:[%s4611_s24 + $0x50] sm:$0xff]  }
  0x55   : > { %3761 = vmatpush3.bf16.msra.mxu0 %v4155_v17  ;;  %3781 = vmatpush3.bf16.msra.mxu1 %v4156_v18  ;;  %v4191_v17 = vld [vmem:[%s4611_s24 + $0x8] sm:$0xff]  }
  0x56   : > { %3762 = vmatprep.subr.bf16.mxu0 %v4435_v10  ;;  %3782 = vmatprep.subr.bf16.mxu1 %v4435_v10  ;;  %v4192_v18 = vld [vmem:[%s4611_s24 + $0x48] sm:$0xff]  }
  0x59   : > { %3763 = vmatpush3.bf16.msra.mxu0 %v4157_v19  ;;  %3783 = vmatpush3.bf16.msra.mxu1 %v4158_v20  ;;  %v4193_v19 = vld [vmem:[%s4611_s24] sm:$0xff]  }
  0x5a   : > { %3764 = vmatprep.subr.bf16.mxu0 %v4435_v10  ;;  %3784 = vmatprep.subr.bf16.mxu1 %v4435_v10  ;;  %v4194_v20 = vld [vmem:[%s4611_s24 + $0x40] sm:$0xff]  }
  0x5d   : > { %3765 = vmatpush3.bf16.msra.mxu0 %v4159_v21  ;;  %3785 = vmatpush3.bf16.msra.mxu1 %v4160_v22  ;;  %v4195_v21 = vld [vmem:[%s4611_s24 + $0xb8] sm:$0xff]  }
  0x5e   : > { %3766 = vmatprep.subr.bf16.mxu0 %v4435_v10  ;;  %3786 = vmatprep.subr.bf16.mxu1 %v4435_v10  ;;  %v4196_v22 = vld [vmem:[%s4611_s24 + $0xf8] sm:$0xff]  }
  0x61   : > { %3767 = vmatpush3.bf16.msra.mxu0 %v4161_v23  ;;  %3787 = vmatpush3.bf16.msra.mxu1 %v4162_v24  ;;  %v4197_v23 = vld [vmem:[%s4611_s24 + $0xb0] sm:$0xff]  }
  0x62   : > { %3792 = vmatprep.subr.bf16.mxu0 %v4435_v10  ;;  %3812 = vmatprep.subr.bf16.mxu1 %v4435_v10  ;;  %v4198_v24 = vld [vmem:[%s4611_s24 + $0xf0] sm:$0xff]  }
  0xd3   : > { %v712_v25 = vpop.xlane.xlu0 %711 }
  0xd4   : > { %v718_v26 = vmul.f32 0.0078125, %v712_v25  ;;  %v4199_v25 = vld [vmem:[%s4611_s24 + $0xa8] sm:$0xff]  }
  0xd5   : > { %v723_v27 = vpop.xlane.xlu1 %722 }
  0xd6   : > { %v729_v28 = vmul.f32 %v718_v26, %v718_v26  ;;  %v727_v29 = vmul.f32 0.0078125, %v723_v27  ;;  %v733_v39 = vsub.f32 %v4662_v2, %v718_v26  ;;  %v4177_v2 = vld [vmem:[%s4606_s16 + $0x80] sm:$0xff]   ;;  %v4200_v26 = vld [vmem:[%s4611_s24 + $0xe8] sm:$0xff]  }
  0xd7   : > { %v716_v30 = vpop.xlane.xlu0 %715  ;;  %v4201_v27 = vld [vmem:[%s4611_s24 + $0xa0] sm:$0xff]  }
  0xd8   : > { %v731_v31 = vsub.f32 %v727_v29, %v729_v28  ;;  %v719_v32 = vmul.f32 0.0078125, %v716_v30  ;;  %v4202_v28 = vld [vmem:[%s4611_s24 + $0xe0] sm:$0xff]   ;;  %v4203_v29 = vld [vmem:[%s4611_s24 + $0x98] sm:$0xff]  }
  0xd9   : > { %v726_v33 = vpop.xlane.xlu1 %725  ;;  %v4204_v30 = vld [vmem:[%s4611_s24 + $0xd8] sm:$0xff]  }
  0xda   : > { %v735_v34 = vadd.f32 1e-05, %v731_v31  ;;  %v730_v35 = vmul.f32 %v719_v32, %v719_v32  ;;  %v728_v36 = vmul.f32 0.0078125, %v726_v33  ;;  %v734_v43 = vsub.f32 %v4664_v3, %v719_v32  ;;  %v4178_v3 = vld [vmem:[%s4606_s16 + $0xc0] sm:$0xff]   ;;  %v4205_v31 = vld [vmem:[%s4611_s24 + $0x90] sm:$0xff]   ;;  %s5185_s16 = sld [smem:[#allocation18_spill]] }
  0xdb   : > { %v4206_v32 = vld [vmem:[%s4611_s24 + $0xd0] sm:$0xff]   ;;  %v4207_v33 = vld [vmem:[%s4611_s24 + $0x88] sm:$0xff]  }
  0xdc   : > { %4291 = vrsqrt.f32 %v735_v34  ;;  %v732_v37 = vsub.f32 %v728_v36, %v730_v35  ;;  %v4208_v34 = vld [vmem:[%s4611_s24 + $0xc8] sm:$0xff]   ;;  %v4209_v35 = vld [vmem:[%s4611_s24 + $0x80] sm:$0xff]  }
  0xdd   : > { %v4210_v36 = vld [vmem:[%s4611_s24 + $0xc0] sm:$0xff]  }
  0xde   : > { %v736_v38 = vadd.f32 1e-05, %v732_v37 }
  0xe0   : > { %4293 = vrsqrt.f32 %v736_v38  ;;  %v4211_v37 = vld [vmem:[%s5185_s16 + $0x38] sm:$0xff]  }
  0xe1   : > { %v4212_v38 = vld [vmem:[%s5185_s16 + $0x78] sm:$0xff]  }
  0xe9   : > { %v4292_v40 = vpop.eup %4291 }
  0xea   : > { %v739_v41 = vmul.f32 %v4292_v40, %v733_v39  ;;  %v4213_v39 = vld [vmem:[%s5185_s16 + $0x30] sm:$0xff]  }
  0xeb   : > { %v4214_v40 = vld [vmem:[%s5185_s16 + $0x70] sm:$0xff]  }
  0xec   : > { %v747_v45 = vmul.f32 %v3429_v42, %v739_v41  ;;  %v4215_v41 = vld [vmem:[%s5185_s16 + $0x28] sm:$0xff]  }
  0xed   : > { %v4294_v44 = vpop.eup %4293 }
  0xee   : > { %v740_v46 = vmul.f32 %v4294_v44, %v734_v43  ;;  %v755_v49 = vadd.f32 %v3430_v47, %v747_v45  ;;  %v4217_v43 = vld [vmem:[%s5185_s16 + $0x20] sm:$0xff]   ;;  %v4219_v45 = vld [vmem:[%s5185_s16 + $0x18] sm:$0xff]  }
  0xef   : > { %v4218_v44 = vld [vmem:[%s5185_s16 + $0x60] sm:$0xff]  }
  0xf0   : > { %v748_v48 = vmul.f32 %v3429_v42, %v740_v46  ;;  %v4216_v42 = vld [vmem:[%s5185_s16 + $0x68] sm:$0xff]   ;;  %v4220_v46 = vld [vmem:[%s5185_s16 + $0x58] sm:$0xff]  }
  0xf2   : > { %v756_v50 = vadd.f32 %v3430_v47, %v748_v48  ;;  %v4221_v47 = vld [vmem:[%s5185_s16 + $0x10] sm:$0xff]  }
  0xf3   : > { %v4222_v48 = vld [vmem:[%s5185_s16 + $0x50] sm:$0xff]  }
  0xf4   : > { %v4726_v53 = vpack.c.bf16 %v756_v50, %v755_v49  ;;  %v4223_v49 = vld [vmem:[%s5185_s16 + $0x8] sm:$0xff]  }
  0xf5   : > { %v4224_v50 = vld [vmem:[%s5185_s16 + $0x48] sm:$0xff]  }
  0xf6   : > { %3769 = vmatmul.mubr.bf16.vlgmr.msra.gmra.mxu0 %v4726_v53  ;;  %3789 = vmatmul.mubr.bf16.vlgmr.msra.gmra.mxu1 %v4726_v53 }
  0xf7   : > { %3793 = vmatpush3.bf16.msra.mxu0 %v4163_v51  ;;  %3813 = vmatpush3.bf16.msra.mxu1 %v4164_v52  ;;  %v4225_v51 = vld [vmem:[%s5185_s16] sm:$0xff]  }
  0xf8   : > { %3794 = vmatprep.subr.bf16.mxu0 %v4435_v10  ;;  %3814 = vmatprep.subr.bf16.mxu1 %v4435_v10  ;;  %v4226_v52 = vld [vmem:[%s5185_s16 + $0x40] sm:$0xff]  }
  0xf9   : > { %3808 = vmatprep.mubr.msk.bf16.mxu0 %vm4436_vm1, %v4435_v10  ;;  %3828 = vmatprep.mubr.msk.bf16.mxu1 %vm4436_vm1, %v4435_v10 }
  0xfb   : > { %3795 = vmatpush3.bf16.msra.mxu0 %v4165_v54  ;;  %3815 = vmatpush3.bf16.msra.mxu1 %v4166_v55  ;;  %v4227_v54 = vld [vmem:[%s5185_s16 + $0xb8] sm:$0xff]  }
  0xfc   : > { %3796 = vmatprep.subr.bf16.mxu0 %v4435_v10  ;;  %3816 = vmatprep.subr.bf16.mxu1 %v4435_v10  ;;  %v4228_v55 = vld [vmem:[%s5185_s16 + $0xf8] sm:$0xff]  }
  0xff   : > { %3797 = vmatpush3.bf16.msra.mxu0 %v4167_v56  ;;  %3817 = vmatpush3.bf16.msra.mxu1 %v4168_v57  ;;  %v4229_v56 = vld [vmem:[%s5185_s16 + $0xb0] sm:$0xff]  }
 0x100   : > { %3798 = vmatprep.subr.bf16.mxu0 %v4435_v10  ;;  %3818 = vmatprep.subr.bf16.mxu1 %v4435_v10  ;;  %v4230_v57 = vld [vmem:[%s5185_s16 + $0xf0] sm:$0xff]  }
 0x103   : > { %3799 = vmatpush3.bf16.msra.mxu0 %v4169_v58  ;;  %3819 = vmatpush3.bf16.msra.mxu1 %v4170_v59  ;;  %v4231_v58 = vld [vmem:[%s5185_s16 + $0xa8] sm:$0xff]  }
 0x104   : > { %3800 = vmatprep.subr.bf16.mxu0 %v4435_v10  ;;  %3820 = vmatprep.subr.bf16.mxu1 %v4435_v10  ;;  %v4232_v59 = vld [vmem:[%s5185_s16 + $0xe8] sm:$0xff]  }
 0x107   : > { %3801 = vmatpush3.bf16.msra.mxu0 %v4171_v60  ;;  %3821 = vmatpush3.bf16.msra.mxu1 %v4172_v61  ;;  %v4233_v60 = vld [vmem:[%s5185_s16 + $0xa0] sm:$0xff]  }
 0x108   : > { %3802 = vmatprep.subr.bf16.mxu0 %v4435_v10  ;;  %3822 = vmatprep.subr.bf16.mxu1 %v4435_v10  ;;  %v4234_v61 = vld [vmem:[%s5185_s16 + $0xe0] sm:$0xff]  }
 0x10b   : > { %3803 = vmatpush3.bf16.msra.mxu0 %v4173_v62  ;;  %3823 = vmatpush3.bf16.msra.mxu1 %v4174_v63  ;;  %v4235_v62 = vld [vmem:[%s5185_s16 + $0x98] sm:$0xff]  }
 0x10c   : > { %3804 = vmatprep.subr.bf16.mxu0 %v4435_v10  ;;  %3824 = vmatprep.subr.bf16.mxu1 %v4435_v10  ;;  %v4236_v63 = vld [vmem:[%s5185_s16 + $0xd8] sm:$0xff]  }
 0x10f   : > { %3805 = vmatpush3.bf16.msra.mxu0 %v4175_v0  ;;  %3825 = vmatpush3.bf16.msra.mxu1 %v4176_v1  ;;  %v4237_v0 = vld [vmem:[%s5185_s16 + $0x90] sm:$0xff]  }
 0x110   : > { %3806 = vmatprep.subr.bf16.mxu0 %v4435_v10  ;;  %3826 = vmatprep.subr.bf16.mxu1 %v4435_v10  ;;  %v4238_v1 = vld [vmem:[%s5185_s16 + $0xd0] sm:$0xff]  }
 0x113   : > { %3807 = vmatpush3.bf16.msra.mxu0 %v4177_v2  ;;  %3827 = vmatpush3.bf16.msra.mxu1 %v4178_v3  ;;  %v4239_v2 = vld [vmem:[%s5185_s16 + $0x88] sm:$0xff]  }
 0x114   : > { %3832 = vmatprep.subr.bf16.mxu0 %v4435_v10  ;;  %3852 = vmatprep.subr.bf16.mxu1 %v4435_v10  ;;  %v4240_v3 = vld [vmem:[%s5185_s16 + $0xc8] sm:$0xff]  }
 0x116   : > { %3809 = vmatmul.mubr.bf16.vlgmr.msra.gmra.mxu0 %v4726_v53  ;;  %3829 = vmatmul.mubr.bf16.vlgmr.msra.gmra.mxu1 %v4726_v53 }
 0x117   : > { %3833 = vmatpush3.bf16.msra.mxu0 %v4179_v4  ;;  %3853 = vmatpush3.bf16.msra.mxu1 %v4180_v5  ;;  %v4241_v4 = vld [vmem:[%s5185_s16 + $0x80] sm:$0xff]  }
 0x118   : > { %3834 = vmatprep.subr.bf16.mxu0 %v4435_v10  ;;  %3854 = vmatprep.subr.bf16.mxu1 %v4435_v10  ;;  %v4242_v5 = vld [vmem:[%s5185_s16 + $0xc0] sm:$0xff]  }
 0x119   : > { %3848 = vmatprep.mubr.msk.bf16.mxu0 %vm4436_vm1, %v4435_v10  ;;  %3868 = vmatprep.mubr.msk.bf16.mxu1 %vm4436_vm1, %v4435_v10 }
 0x11b   : > { %3835 = vmatpush3.bf16.msra.mxu0 %v4181_v6  ;;  %3855 = vmatpush3.bf16.msra.mxu1 %v4182_v7 }
 0x11c   : > { %3836 = vmatprep.subr.bf16.mxu0 %v4435_v10  ;;  %3856 = vmatprep.subr.bf16.mxu1 %v4435_v10 }
 0x11f   : > { %3837 = vmatpush3.bf16.msra.mxu0 %v4183_v8  ;;  %3857 = vmatpush3.bf16.msra.mxu1 %v4184_v9 }
 0x120   : > { %3838 = vmatprep.subr.bf16.mxu0 %v4435_v10  ;;  %3858 = vmatprep.subr.bf16.mxu1 %v4435_v10 }
 0x123   : > { %3839 = vmatpush3.bf16.msra.mxu0 %v4185_v11  ;;  %3859 = vmatpush3.bf16.msra.mxu1 %v4186_v12 }
 0x124   : > { %3840 = vmatprep.subr.bf16.mxu0 %v4435_v10  ;;  %3860 = vmatprep.subr.bf16.mxu1 %v4435_v10 }
 0x127   : > { %3841 = vmatpush3.bf16.msra.mxu0 %v4187_v13  ;;  %3861 = vmatpush3.bf16.msra.mxu1 %v4188_v14 }
 0x128   : > { %3842 = vmatprep.subr.bf16.mxu0 %v4435_v10  ;;  %3862 = vmatprep.subr.bf16.mxu1 %v4435_v10 }
 0x12b   : > { %3843 = vmatpush3.bf16.msra.mxu0 %v4189_v15  ;;  %3863 = vmatpush3.bf16.msra.mxu1 %v4190_v16 }
 0x12c   : > { %3844 = vmatprep.subr.bf16.mxu0 %v4435_v10  ;;  %3864 = vmatprep.subr.bf16.mxu1 %v4435_v10 }
 0x12f   : > { %3845 = vmatpush3.bf16.msra.mxu0 %v4191_v17  ;;  %3865 = vmatpush3.bf16.msra.mxu1 %v4192_v18 }
 0x130   : > { %3846 = vmatprep.subr.bf16.mxu0 %v4435_v10  ;;  %3866 = vmatprep.subr.bf16.mxu1 %v4435_v10 }
 0x133   : > { %3847 = vmatpush3.bf16.msra.mxu0 %v4193_v19  ;;  %3867 = vmatpush3.bf16.msra.mxu1 %v4194_v20 }
 0x134   : > { %3872 = vmatprep.subr.bf16.mxu0 %v4435_v10  ;;  %3892 = vmatprep.subr.bf16.mxu1 %v4435_v10 }
 0x136   : > { %3849 = vmatmul.mubr.bf16.vlgmr.msra.gmra.mxu0 %v4726_v53  ;;  %3869 = vmatmul.mubr.bf16.vlgmr.msra.gmra.mxu1 %v4726_v53 }
 0x137   : > { %3873 = vmatpush3.bf16.msra.mxu0 %v4195_v21  ;;  %3893 = vmatpush3.bf16.msra.mxu1 %v4196_v22 }
 0x138   : > { %3874 = vmatprep.subr.bf16.mxu0 %v4435_v10  ;;  %3894 = vmatprep.subr.bf16.mxu1 %v4435_v10 }
 0x139   : > { %3888 = vmatprep.mubr.msk.bf16.mxu0 %vm4436_vm1, %v4435_v10  ;;  %3908 = vmatprep.mubr.msk.bf16.mxu1 %vm4436_vm1, %v4435_v10 }
 0x13b   : > { %3875 = vmatpush3.bf16.msra.mxu0 %v4197_v23  ;;  %3895 = vmatpush3.bf16.msra.mxu1 %v4198_v24 }
 0x13c   : > { %3876 = vmatprep.subr.bf16.mxu0 %v4435_v10  ;;  %3896 = vmatprep.subr.bf16.mxu1 %v4435_v10 }
 0x13f   : > { %3877 = vmatpush3.bf16.msra.mxu0 %v4199_v25  ;;  %3897 = vmatpush3.bf16.msra.mxu1 %v4200_v26 }
 0x140   : > { %3878 = vmatprep.subr.bf16.mxu0 %v4435_v10  ;;  %3898 = vmatprep.subr.bf16.mxu1 %v4435_v10 }
 0x143   : > { %3879 = vmatpush3.bf16.msra.mxu0 %v4201_v27  ;;  %3899 = vmatpush3.bf16.msra.mxu1 %v4202_v28 }
 0x144   : > { %3880 = vmatprep.subr.bf16.mxu0 %v4435_v10  ;;  %3900 = vmatprep.subr.bf16.mxu1 %v4435_v10 }
 0x147   : > { %3881 = vmatpush3.bf16.msra.mxu0 %v4203_v29  ;;  %3901 = vmatpush3.bf16.msra.mxu1 %v4204_v30 }
 0x148   : > { %3882 = vmatprep.subr.bf16.mxu0 %v4435_v10  ;;  %3902 = vmatprep.subr.bf16.mxu1 %v4435_v10 }
 0x14b   : > { %3883 = vmatpush3.bf16.msra.mxu0 %v4205_v31  ;;  %3903 = vmatpush3.bf16.msra.mxu1 %v4206_v32 }
 0x14c   : > { %3884 = vmatprep.subr.bf16.mxu0 %v4435_v10  ;;  %3904 = vmatprep.subr.bf16.mxu1 %v4435_v10 }
 0x14f   : > { %3885 = vmatpush3.bf16.msra.mxu0 %v4207_v33  ;;  %3905 = vmatpush3.bf16.msra.mxu1 %v4208_v34 }
 0x150   : > { %3886 = vmatprep.subr.bf16.mxu0 %v4435_v10  ;;  %3906 = vmatprep.subr.bf16.mxu1 %v4435_v10 }
 0x153   : > { %3887 = vmatpush3.bf16.msra.mxu0 %v4209_v35  ;;  %3907 = vmatpush3.bf16.msra.mxu1 %v4210_v36 }
 0x154   : > { %3912 = vmatprep.subr.bf16.mxu0 %v4435_v10  ;;  %3932 = vmatprep.subr.bf16.mxu1 %v4435_v10 }
 0x156   : > { %3889 = vmatmul.mubr.bf16.vlgmr.msra.gmra.mxu0 %v4726_v53  ;;  %3909 = vmatmul.mubr.bf16.vlgmr.msra.gmra.mxu1 %v4726_v53 }
 0x157   : > { %3913 = vmatpush3.bf16.msra.mxu0 %v4211_v37  ;;  %3933 = vmatpush3.bf16.msra.mxu1 %v4212_v38 }
 0x158   : > { %3914 = vmatprep.subr.bf16.mxu0 %v4435_v10  ;;  %3934 = vmatprep.subr.bf16.mxu1 %v4435_v10 }
 0x159   : > { %3928 = vmatprep.mubr.msk.bf16.mxu0 %vm4436_vm1, %v4435_v10  ;;  %3948 = vmatprep.mubr.msk.bf16.mxu1 %vm4436_vm1, %v4435_v10 }
 0x15b   : > { %3915 = vmatpush3.bf16.msra.mxu0 %v4213_v39  ;;  %3935 = vmatpush3.bf16.msra.mxu1 %v4214_v40 }
 0x15c   : > { %3916 = vmatprep.subr.bf16.mxu0 %v4435_v10  ;;  %3936 = vmatprep.subr.bf16.mxu1 %v4435_v10 }
 0x15f   : > { %3917 = vmatpush3.bf16.msra.mxu0 %v4215_v41  ;;  %3937 = vmatpush3.bf16.msra.mxu1 %v4216_v42 }
 0x160   : > { %3918 = vmatprep.subr.bf16.mxu0 %v4435_v10  ;;  %3938 = vmatprep.subr.bf16.mxu1 %v4435_v10 }
 0x163   : > { %3919 = vmatpush3.bf16.msra.mxu0 %v4217_v43  ;;  %3939 = vmatpush3.bf16.msra.mxu1 %v4218_v44 }
 0x164   : > { %3920 = vmatprep.subr.bf16.mxu0 %v4435_v10  ;;  %3940 = vmatprep.subr.bf16.mxu1 %v4435_v10 }
 0x167   : > { %3921 = vmatpush3.bf16.msra.mxu0 %v4219_v45  ;;  %3941 = vmatpush3.bf16.msra.mxu1 %v4220_v46 }
 0x168   : > { %3922 = vmatprep.subr.bf16.mxu0 %v4435_v10  ;;  %3942 = vmatprep.subr.bf16.mxu1 %v4435_v10 }
 0x16b   : > { %3923 = vmatpush3.bf16.msra.mxu0 %v4221_v47  ;;  %3943 = vmatpush3.bf16.msra.mxu1 %v4222_v48 }
 0x16c   : > { %3924 = vmatprep.subr.bf16.mxu0 %v4435_v10  ;;  %3944 = vmatprep.subr.bf16.mxu1 %v4435_v10 }
 0x16f   : > { %3925 = vmatpush3.bf16.msra.mxu0 %v4223_v49  ;;  %3945 = vmatpush3.bf16.msra.mxu1 %v4224_v50 }
 0x170   : > { %3926 = vmatprep.subr.bf16.mxu0 %v4435_v10  ;;  %3946 = vmatprep.subr.bf16.mxu1 %v4435_v10 }
 0x173   : > { %3927 = vmatpush3.bf16.msra.mxu0 %v4225_v51  ;;  %3947 = vmatpush3.bf16.msra.mxu1 %v4226_v52  ;;  %v4437_v52 = vmov 65535  }
 0x174   : > { %3952 = vmatprep.subr.bf16.mxu0 %v4435_v10  ;;  %3972 = vmatprep.subr.bf16.mxu1 %v4435_v10 }
 0x176   : > { %3929 = vmatmul.mubr.bf16.vlgmr.msra.gmra.mxu0 %v4726_v53  ;;  %3949 = vmatmul.mubr.bf16.vlgmr.msra.gmra.mxu1 %v4726_v53 }
 0x177   : > { %3953 = vmatpush3.bf16.msra.mxu0 %v4227_v54  ;;  %3973 = vmatpush3.bf16.msra.mxu1 %v4228_v55  ;;  %v2318_v54 = vsel %vm2316_vm3, 4294967295, %v4437_v52 }
 0x178   : > { %3954 = vmatprep.subr.bf16.mxu0 %v4435_v10  ;;  %3974 = vmatprep.subr.bf16.mxu1 %v4435_v10 }
 0x179   : > { %3968 = vmatprep.mubr.msk.bf16.mxu0 %vm4436_vm1, %v4435_v10  ;;  %3988 = vmatprep.mubr.msk.bf16.mxu1 %vm4436_vm1, %v4435_v10 }
 0x17b   : > { %3955 = vmatpush3.bf16.msra.mxu0 %v4229_v56  ;;  %3975 = vmatpush3.bf16.msra.mxu1 %v4230_v57 }
 0x17c   : > { %3956 = vmatprep.subr.bf16.mxu0 %v4435_v10  ;;  %3976 = vmatprep.subr.bf16.mxu1 %v4435_v10 }
 0x17f   : > { %3957 = vmatpush3.bf16.msra.mxu0 %v4231_v58  ;;  %3977 = vmatpush3.bf16.msra.mxu1 %v4232_v59  ;;  %v2319_v58 = vsel %vm2317_vm4, %v2318_v54, 0 }
 0x180   : > { %3958 = vmatprep.subr.bf16.mxu0 %v4435_v10  ;;  %3978 = vmatprep.subr.bf16.mxu1 %v4435_v10 }
 0x183   : > { %3959 = vmatpush3.bf16.msra.mxu0 %v4233_v60  ;;  %3979 = vmatpush3.bf16.msra.mxu1 %v4234_v61 }
 0x184   : > { %3960 = vmatprep.subr.bf16.mxu0 %v4435_v10  ;;  %3980 = vmatprep.subr.bf16.mxu1 %v4435_v10 }
 0x187   : > { %3961 = vmatpush3.bf16.msra.mxu0 %v4235_v62  ;;  %3981 = vmatpush3.bf16.msra.mxu1 %v4236_v63 }
 0x188   : > { %3962 = vmatprep.subr.bf16.mxu0 %v4435_v10  ;;  %3982 = vmatprep.subr.bf16.mxu1 %v4435_v10 }
 0x18b   : > { %3963 = vmatpush3.bf16.msra.mxu0 %v4237_v0  ;;  %3983 = vmatpush3.bf16.msra.mxu1 %v4238_v1 }
 0x18c   : > { %3964 = vmatprep.subr.bf16.mxu0 %v4435_v10  ;;  %3984 = vmatprep.subr.bf16.mxu1 %v4435_v10 }
 0x18f   : > { %3965 = vmatpush3.bf16.msra.mxu0 %v4239_v2  ;;  %3985 = vmatpush3.bf16.msra.mxu1 %v4240_v3 }
 0x190   : > { %3966 = vmatprep.subr.bf16.mxu0 %v4435_v10  ;;  %3986 = vmatprep.subr.bf16.mxu1 %v4435_v10 }
 0x193   : > { %3967 = vmatpush3.bf16.msra.mxu0 %v4241_v4  ;;  %3987 = vmatpush3.bf16.msra.mxu1 %v4242_v5 }
 0x194   : > { %3992 = vmatprep.subr.bf16.mxu0 %v4435_v10  ;;  %3998 = vmatprep.subr.bf16.mxu1 %v4435_v10 }
 0x196   : > { %3969 = vmatmul.mubr.bf16.vlgmr.msra.gmra.mxu0 %v4726_v53  ;;  %3989 = vmatmul.mubr.bf16.vlgmr.msra.gmra.mxu1 %v4726_v53 }
 0x197   : > { %3994 = vmatprep.mubr.msk.bf16.mxu0 %vm4436_vm1, %v4435_v10  ;;  %4000 = vmatprep.mubr.msk.bf16.mxu1 %vm4436_vm1, %v4435_v10 }
 0x1b6   : > { %v904_v6 = vpop.f32.mrf.mxu0  ;;  %v993_v7 = vpop.f32.mrf.mxu1 }
 0x1b8   : > { %v3770_v8 = vpop.f32.mrf.mxu0  ;;  %v3790_v9 = vpop.f32.mrf.mxu1 }
 0x1ba   : > { %v907_v11 = vpop.f32.mrf.mxu0  ;;  %v996_v12 = vpop.f32.mrf.mxu1 }
 0x1bb   : > { %v1178_v13 = vpack.c.bf16 %v907_v11, %v904_v6  ;;  %v1179_v14 = vpack.c.bf16 %v996_v12, %v993_v7 }
 0x1bc   : > { %v3771_v15 = vpop.f32.mrf.mxu0  ;;  %v3791_v16 = vpop.f32.mrf.mxu1 }
 0x1d6   : > { %v1082_v17 = vpop.f32.mrf.mxu0  ;;  %v1171_v18 = vpop.f32.mrf.mxu1 }
 0x1d8   : > { %v3810_v19 = vpop.f32.mrf.mxu0  ;;  %v3830_v53 = vpop.f32.mrf.mxu1 }
 0x1da   : > { %v1085_v20 = vpop.f32.mrf.mxu0  ;;  %v1174_v21 = vpop.f32.mrf.mxu1 }
 0x1db   : > { %v1180_v22 = vpack.c.bf16 %v1085_v20, %v1082_v17  ;;  %v1181_v23 = vpack.c.bf16 %v1174_v21, %v1171_v18 }
 0x1dc   : > { %v3811_v24 = vpop.f32.mrf.mxu0  ;;  %v3831_v25 = vpop.f32.mrf.mxu1 }
 0x1f6   : > { %v1328_v26 = vpop.f32.mrf.mxu0  ;;  %v1417_v27 = vpop.f32.mrf.mxu1 }
 0x1f8   : > { %v3850_v28 = vpop.f32.mrf.mxu0  ;;  %v3870_v29 = vpop.f32.mrf.mxu1 }
 0x1fa   : > { %v1331_v30 = vpop.f32.mrf.mxu0  ;;  %v1420_v31 = vpop.f32.mrf.mxu1 }
 0x1fb   : > { %v1602_v32 = vpack.c.bf16 %v1331_v30, %v1328_v26  ;;  %v1603_v33 = vpack.c.bf16 %v1420_v31, %v1417_v27 }
 0x1fc   : > { %v3851_v34 = vpop.f32.mrf.mxu0  ;;  %v3871_v35 = vpop.f32.mrf.mxu1 }
 0x1fd   : > { %v2035_v36 = vsel %vm2030_vm2, %v1602_v32, 0  ;;  %v2082_v37 = vsel %vm2030_vm2, %v1603_v33, 0 }
 0x1fe   : > { %3993 = vmatpush3.bf16.xpose.msra.mxu0 %v2035_v36  ;;  %3999 = vmatpush3.bf16.xpose.msra.mxu1 %v2082_v37 }
 0x1ff   : > { %4004 = vmatprep.subr.bf16.mxu0 %v4435_v10  ;;  %4010 = vmatprep.subr.bf16.mxu1 %v4435_v10 }
 0x205   : > { %3995 = vmatmul.mubr.msk.bf16.vlgmr.msra.gmra.mxu0 %vm2030_vm2, %v1178_v13  ;;  %4001 = vmatmul.mubr.msk.bf16.vlgmr.msra.gmra.mxu1 %vm2030_vm2, %v1179_v14 }
 0x206   : > { %4006 = vmatprep.mubr.msk.bf16.mxu0 %vm4436_vm1, %v4435_v10  ;;  %4012 = vmatprep.mubr.msk.bf16.mxu1 %vm4436_vm1, %v4435_v10 }
 0x216   : > { %v1506_v38 = vpop.f32.mrf.mxu0  ;;  %v1595_v39 = vpop.f32.mrf.mxu1 }
 0x218   : > { %v3890_v40 = vpop.f32.mrf.mxu0  ;;  %v3910_v41 = vpop.f32.mrf.mxu1 }
 0x21a   : > { %v1509_v42 = vpop.f32.mrf.mxu0  ;;  %v1598_v43 = vpop.f32.mrf.mxu1 }
 0x21b   : > { %v1604_v44 = vpack.c.bf16 %v1509_v42, %v1506_v38  ;;  %v1605_v45 = vpack.c.bf16 %v1598_v43, %v1595_v39 }
 0x21c   : > { %v3891_v46 = vpop.f32.mrf.mxu0  ;;  %v3911_v47 = vpop.f32.mrf.mxu1 }
 0x21d   : > { %v2129_v48 = vsel %vm2030_vm2, %v1604_v44, 0  ;;  %v2176_v49 = vsel %vm2030_vm2, %v1605_v45, 0 }
 0x21e   : > { %4005 = vmatpush3.bf16.xpose.msra.mxu0 %v2129_v48  ;;  %4011 = vmatpush3.bf16.xpose.msra.mxu1 %v2176_v49 }
 0x21f   : > { %4016 = vmatprep.subr.bf16.mxu0 %v4435_v10  ;;  %4022 = vmatprep.subr.bf16.mxu1 %v4435_v10 }
 0x225   : > { %4007 = vmatmul.mubr.msk.bf16.vlgmr.msra.gmra.mxu0 %vm2030_vm2, %v1180_v22  ;;  %4013 = vmatmul.mubr.msk.bf16.vlgmr.msra.gmra.mxu1 %vm2030_vm2, %v1181_v23 }
 0x226   : > { %4018 = vmatprep.mubr.msk.bf16.mxu0 %vm4436_vm1, %v4435_v10  ;;  %4024 = vmatprep.mubr.msk.bf16.mxu1 %vm4436_vm1, %v4435_v10 }
 0x236   : > { %v1752_v50 = vpop.f32.mrf.mxu0  ;;  %v1841_v51 = vpop.f32.mrf.mxu1 }
 0x238   : > { %v3930_v55 = vpop.f32.mrf.mxu0  ;;  %v3950_v56 = vpop.f32.mrf.mxu1 }
 0x23a   : > { %v1755_v57 = vpop.f32.mrf.mxu0  ;;  %v1844_v59 = vpop.f32.mrf.mxu1 }
 0x23b   : > { %v2026_v60 = vpack.c.bf16 %v1755_v57, %v1752_v50  ;;  %v2027_v61 = vpack.c.bf16 %v1844_v59, %v1841_v51 }
 0x23c   : > { %v3931_v62 = vpop.f32.mrf.mxu0  ;;  %v3951_v63 = vpop.f32.mrf.mxu1 }
 0x23d   : > { %v2321_v0 = vand.u32 %v2319_v58, %v2026_v60  ;;  %v2368_v1 = vand.u32 %v2319_v58, %v2027_v61 }
 0x23f   : > { %4017 = vmatpush3.bf16.msra.mxu0 %v2321_v0  ;;  %4023 = vmatpush3.bf16.msra.mxu1 %v2368_v1 }
 0x240   : > { %4028 = vmatprep.subr.bf16.mxu0 %v4435_v10  ;;  %4034 = vmatprep.subr.bf16.mxu1 %v4435_v10 }
 0x256   : > { %v1930_v2 = vpop.f32.mrf.mxu0  ;;  %v2019_v3 = vpop.f32.mrf.mxu1 }
 0x258   : > { %v3970_v4 = vpop.f32.mrf.mxu0  ;;  %v3990_v5 = vpop.f32.mrf.mxu1 }
 0x25a   : > { %v1933_v6 = vpop.f32.mrf.mxu0  ;;  %v2022_v7 = vpop.f32.mrf.mxu1 }
 0x25b   : > { %v2028_v8 = vpack.c.bf16 %v1933_v6, %v1930_v2  ;;  %v2029_v9 = vpack.c.bf16 %v2022_v7, %v2019_v3 }
 0x25c   : > { %v3971_v11 = vpop.f32.mrf.mxu0  ;;  %v3991_v12 = vpop.f32.mrf.mxu1 }
 0x25d   : > { %v4944_v13 = vand.u32 %v2319_v58, %v2028_v8  ;;  %v4946_v14 = vand.u32 %v2319_v58, %v2029_v9 }
 0x2c5   : > { %v2071_v15 = vpop.f32.mrf.mxu0  ;;  %v2118_v16 = vpop.f32.mrf.mxu1 }
 0x2c6   : > { %v2220_v17 = vsel %vm2219_vm5, %v2071_v15, -inf  ;;  %v2227_v21 = vsel %vm2219_vm5, %v2118_v16, -inf }
 0x2c7   : > { %v4002_v18 = vpop.f32.mrf.mxu1  ;;  %2221 = vmax.xlane.f32.xlu0 %v2220_v17  ;;  %v3996_v19 = vpop.f32.mrf.mxu0 }
 0x2c9   : > { %v2074_v53 = vpop.f32.mrf.mxu0  ;;  %v2121_v20 = vpop.f32.mrf.mxu1 }
 0x2ca   : > { %v2224_v22 = vsel %vm2223_vm6, %v2074_v53, -inf  ;;  %v2230_v25 = vsel %vm2223_vm6, %v2121_v20, -inf }
 0x2cb   : > { %v4003_v23 = vpop.f32.mrf.mxu1  ;;  %2228 = vmax.xlane.f32.xlu0 %v2227_v21  ;;  %2225 = vmax.xlane.f32.xlu1 %v2224_v22  ;;  %v3997_v24 = vpop.f32.mrf.mxu0 }
 0x2cf   : > { %2231 = vmax.xlane.f32.xlu1 %v2230_v25 }
 0x2e5   : > { %v2165_v26 = vpop.f32.mrf.mxu0  ;;  %v2212_v27 = vpop.f32.mrf.mxu1 }
 0x2e6   : > { %v2233_v28 = vsel %vm2219_vm5, %v2165_v26, -inf  ;;  %v2239_v33 = vsel %vm2219_vm5, %v2212_v27, -inf }
 0x2e7   : > { %v4014_v29 = vpop.f32.mrf.mxu1  ;;  %2234 = vmax.xlane.f32.xlu0 %v2233_v28  ;;  %v4008_v30 = vpop.f32.mrf.mxu0 }
 0x2e9   : > { %v2168_v31 = vpop.f32.mrf.mxu0  ;;  %v2215_v32 = vpop.f32.mrf.mxu1 }
 0x2ea   : > { %v2236_v34 = vsel %vm2223_vm6, %v2168_v31, -inf  ;;  %v2242_v37 = vsel %vm2223_vm6, %v2215_v32, -inf }
 0x2eb   : > { %v4015_v35 = vpop.f32.mrf.mxu1  ;;  %2240 = vmax.xlane.f32.xlu0 %v2239_v33  ;;  %2237 = vmax.xlane.f32.xlu1 %v2236_v34  ;;  %v4009_v36 = vpop.f32.mrf.mxu0 }
 0x2ef   : > { %2243 = vmax.xlane.f32.xlu1 %v2242_v37 }
 0x350   : > { %v2222_v38 = vpop.xlane.xlu0 %2221 }
 0x351   : > { %v2245_v39 = vsub.f32 %v2071_v15, %v2222_v38 }
 0x353   : > { %v2253_v40 = vmul.f32 1.442695, %v2245_v39 }
 0x354   : > { %v2229_v41 = vpop.xlane.xlu0 %2228  ;;  %v2226_v42 = vpop.xlane.xlu1 %2225 }
 0x355   : > { %4295 = vpow2.f32 %v2253_v40  ;;  %v2247_v43 = vsub.f32 %v2118_v16, %v2229_v41  ;;  %v2246_v44 = vsub.f32 %v2074_v53, %v2226_v42 }
 0x357   : > { %v2257_v45 = vmul.f32 1.442695, %v2247_v43  ;;  %v2255_v46 = vmul.f32 1.442695, %v2246_v44  ;;  %v4243_v43 = vld [vmem:[%s4622_s20 + $0x8] sm:$0xff]   ;;  %v4244_v44 = vld [vmem:[%s4622_s20] sm:$0xff]  }
 0x358   : > { %v2232_v47 = vpop.xlane.xlu1 %2231 }
 0x359   : > { %4297 = vpow2.f32 %v2257_v45  ;;  %v2248_v48 = vsub.f32 %v2121_v20, %v2232_v47  ;;  %v4245_v45 = vld [vmem:[%s4622_s20 + $0x18] sm:$0xff]  }
 0x35a   : > { %4299 = vpow2.f32 %v2255_v46  ;;  %v4246_v46 = vld [vmem:[%s4622_s20 + $0x10] sm:$0xff]  }
 0x35b   : > { %v2259_v49 = vmul.f32 1.442695, %v2248_v48 }
 0x35d   : > { %4301 = vpow2.f32 %v2259_v49 }
 0x362   : > { %v4296_v50 = vpop.eup %4295 }
 0x363   : > { %v2269_v51 = vsel %vm2219_vm5, %v4296_v50, 0.0 }
 0x364   : > { %2270 = vadd.xlane.f32.xlu0 %v2269_v51  ;;  %v4247_v51 = vld [vmem:[%s4622_s20 + $0x28] sm:$0xff]  }
 0x366   : > { %v4298_v52 = vpop.eup %4297 }
 0x367   : > { %v4300_v54 = vpop.eup %4299  ;;  %v2275_v55 = vsel %vm2219_vm5, %v4298_v52, 0.0 }
 0x368   : > { %2276 = vadd.xlane.f32.xlu0 %v2275_v55  ;;  %v2272_v56 = vsel %vm2223_vm6, %v4300_v54, 0.0 }
 0x369   : > { %2273 = vadd.xlane.f32.xlu1 %v2272_v56 }
 0x36a   : > { %v4302_v57 = vpop.eup %4301 }
 0x36b   : > { %v2278_v58 = vsel %vm2223_vm6, %v4302_v57, 0.0 }
 0x36d   : > { %2279 = vadd.xlane.f32.xlu1 %v2278_v58  ;;  %v4249_v58 = vld [vmem:[%s4622_s20 + $0x38] sm:$0xff]  }
 0x370   : > { %v2235_v59 = vpop.xlane.xlu0 %2234 }
 0x371   : > { %v2249_v60 = vsub.f32 %v2165_v26, %v2235_v59 }
 0x373   : > { %v2261_v61 = vmul.f32 1.442695, %v2249_v60 }
 0x374   : > { %v2241_v62 = vpop.xlane.xlu0 %2240  ;;  %v2238_v63 = vpop.xlane.xlu1 %2237 }
 0x375   : > { %4303 = vpow2.f32 %v2261_v61  ;;  %v2251_v0 = vsub.f32 %v2212_v27, %v2241_v62  ;;  %v2250_v1 = vsub.f32 %v2168_v31, %v2238_v63  ;;  %v4250_v61 = vld [vmem:[%s4622_s20 + $0x30] sm:$0xff]  }
 0x377   : > { %v2265_v2 = vmul.f32 1.442695, %v2251_v0  ;;  %v2263_v3 = vmul.f32 1.442695, %v2250_v1 }
 0x378   : > { %v2244_v4 = vpop.xlane.xlu1 %2243 }
 0x379   : > { %4305 = vpow2.f32 %v2265_v2  ;;  %v2252_v5 = vsub.f32 %v2215_v32, %v2244_v4 }
 0x37a   : > { %4307 = vpow2.f32 %v2263_v3 }
 0x37b   : > { %v2267_v6 = vmul.f32 1.442695, %v2252_v5 }
 0x37d   : > { %4309 = vpow2.f32 %v2267_v6 }
 0x382   : > { %v4304_v7 = vpop.eup %4303 }
 0x383   : > { %v2281_v8 = vsel %vm2219_vm5, %v4304_v7, 0.0 }
 0x384   : > { %2282 = vadd.xlane.f32.xlu0 %v2281_v8 }
 0x386   : > { %v4306_v9 = vpop.eup %4305 }
 0x387   : > { %v4308_v11 = vpop.eup %4307  ;;  %v2287_v12 = vsel %vm2219_vm5, %v4306_v9, 0.0 }
 0x388   : > { %2288 = vadd.xlane.f32.xlu0 %v2287_v12  ;;  %v2284_v15 = vsel %vm2223_vm6, %v4308_v11, 0.0 }
 0x389   : > { %2285 = vadd.xlane.f32.xlu1 %v2284_v15 }
 0x38a   : > { %v4310_v16 = vpop.eup %4309 }
 0x38b   : > { %v2290_v17 = vsel %vm2223_vm6, %v4310_v16, 0.0 }
 0x38d   : > { %2291 = vadd.xlane.f32.xlu1 %v2290_v17 }
 0x3ed   : > { %v2271_v18 = vpop.xlane.xlu0 %2270 }
 0x3ee   : > { %4311 = vrcp.f32 %v2271_v18 }
 0x3f1   : > { %v2277_v19 = vpop.xlane.xlu0 %2276 }
 0x3f2   : > { %v2274_v53 = vpop.xlane.xlu1 %2273 }
 0x3f3   : > { %4313 = vrcp.f32 %v2274_v53 }
 0x3f4   : > { %4315 = vrcp.f32 %v2277_v19 }
 0x3f6   : > { %v2280_v20 = vpop.xlane.xlu1 %2279 }
 0x3f7   : > { %4317 = vrcp.f32 %v2280_v20 }
 0x3fb   : > { %v4312_v21 = vpop.eup %4311 }
 0x3fc   : > { %v2301_v23 = vmul.f32 %v4312_v21, %v4296_v50 }
 0x400   : > { %v4314_v22 = vpop.eup %4313 }
 0x401   : > { %v2302_v24 = vmul.f32 %v4314_v22, %v4300_v54  ;;  %v4316_v25 = vpop.eup %4315 }
 0x402   : > { %v2303_v28 = vmul.f32 %v4316_v25, %v4298_v52 }
 0x403   : > { %v2309_v26 = vpack.c.bf16 %v2302_v24, %v2301_v23 }
 0x404   : > { %v4318_v27 = vpop.eup %4317 }
 0x405   : > { %4019 = vmatmul.mubr.msk.bf16.vlgmr.msra.gmra.mxu0 %vm2219_vm5, %v2309_v26  ;;  %v2304_v29 = vmul.f32 %v4318_v27, %v4302_v57  ;;  %v4248_v57 = vld [vmem:[%s4622_s20 + $0x20] sm:$0xff]  }
 0x406   : > { %4029 = vmatpush3.bf16.msra.mxu0 %v4944_v13  ;;  %4030 = vmatprep.mubr.msk.bf16.mxu0 %vm4436_vm1, %v4435_v10 }
 0x407   : > { %v2310_v30 = vpack.c.bf16 %v2304_v29, %v2303_v28  ;;  %4040 = vmatprep.subr.bf16.mxu0 %v4435_v10  ;;  %v3547_v28 = vld [vmem:[%s5186_s29] ss:$0 sm:$0xff] }
 0x409   : > { %4025 = vmatmul.mubr.msk.bf16.vlgmr.msra.gmra.mxu1 %vm2219_vm5, %v2310_v30 }
 0x40a   : > { %4035 = vmatpush3.bf16.msra.mxu1 %v4946_v14  ;;  %4036 = vmatprep.mubr.msk.bf16.mxu1 %vm4436_vm1, %v4435_v10 }
 0x40b   : > { %4048 = vmatprep.subr.bf16.mxu1 %v4435_v10 }
 0x40d   : > { %v2283_v31 = vpop.xlane.xlu0 %2282 }
 0x40e   : > { %4319 = vrcp.f32 %v2283_v31  ;;  %v4339_v31 = vld [vmem:[#allocation2] sm:$0xff] }
 0x411   : > { %v2289_v32 = vpop.xlane.xlu0 %2288 }
 0x412   : > { %v2286_v33 = vpop.xlane.xlu1 %2285 }
 0x413   : > { %4321 = vrcp.f32 %v2286_v33 }
 0x414   : > { %4323 = vrcp.f32 %v2289_v32 }
 0x416   : > { %v2292_v13 = vpop.xlane.xlu1 %2291 }
 0x417   : > { %4325 = vrcp.f32 %v2292_v13 }
 0x41b   : > { %v4320_v34 = vpop.eup %4319 }
 0x41c   : > { %v2305_v36 = vmul.f32 %v4320_v34, %v4304_v7 }
 0x420   : > { %v4322_v35 = vpop.eup %4321 }
 0x421   : > { %v2306_v14 = vmul.f32 %v4322_v35, %v4308_v11  ;;  %v4324_v37 = vpop.eup %4323 }
 0x422   : > { %v2307_v40 = vmul.f32 %v4324_v37, %v4306_v9  ;;  %v4340_v37 = vld [vmem:[#allocation2 + $0x8] sm:$0x1] }
 0x423   : > { %v2311_v38 = vpack.c.bf16 %v2306_v14, %v2305_v36 }
 0x424   : > { %v4326_v39 = vpop.eup %4325 }
 0x425   : > { %4031 = vmatmul.mubr.msk.bf16.vlgmr.msra.gmra.mxu0 %vm2219_vm5, %v2311_v38  ;;  %v2308_v41 = vmul.f32 %v4326_v39, %v4310_v16 }
 0x426   : > { %4044 = vmatprep.mubr.msk.bf16.mxu0 %vm4436_vm1, %v4435_v10  ;;  %4041 = vmatpush3.bf16.msra.mxu0 %v4243_v43 }
 0x427   : > { %v2312_v42 = vpack.c.bf16 %v2308_v41, %v2307_v40  ;;  %4042 = vmatprep.subr.bf16.mxu0 %v4435_v10 }
 0x429   : > { %4037 = vmatmul.mubr.msk.bf16.vlgmr.msra.gmra.mxu1 %vm2219_vm5, %v2312_v42 }
 0x42a   : > { %4052 = vmatprep.mubr.msk.bf16.mxu1 %vm4436_vm1, %v4435_v10  ;;  %4043 = vmatpush3.bf16.msra.mxu0 %v4244_v44  ;;  %v4253_v44 = vld [vmem:[%s4641_s26 + $0x74] ss:$8 sps:$4 sm:$0xff]  }
 0x42b   : > { %4049 = vmatpush3.bf16.msra.mxu1 %v4245_v45  ;;  %4056 = vmatprep.subr.bf16.mxu0 %v4435_v10  ;;  %v4251_v45 = vld [vmem:[%s4641_s26 + $0x70] ss:$8 sps:$4 sm:$0xff]  }
 0x42c   : > { %4050 = vmatprep.subr.bf16.mxu1 %v4435_v10 }
 0x42f   : > { %4051 = vmatpush3.bf16.msra.mxu1 %v4246_v46  ;;  %v4256_v46 = vld [vmem:[%s4641_s26 + $0x64] ss:$8 sps:$4 sm:$0xff]  }
 0x430   : > { %4064 = vmatprep.subr.bf16.mxu1 %v4435_v10 }
 0x4c5   : > { %v2357_v47 = vpop.f32.mrf.mxu0 }
 0x4c7   : > { %v4020_v48 = vpop.f32.mrf.mxu0 }
 0x4c8   : > { %v4259_v48 = vld [vmem:[%s4641_s26 + $0x54] ss:$8 sps:$4 sm:$0xff]  }
 0x4c9   : > { %v2360_v49 = vpop.f32.mrf.mxu0  ;;  %v2404_v50 = vpop.f32.mrf.mxu1 }
 0x4ca   : > { %v2505_v52 = vpack.c.bf16 %v2360_v49, %v2357_v47  ;;  %v4254_v47 = vld [vmem:[%s4641_s26 + $0x60] ss:$8 sps:$4 sm:$0xff]   ;;  %v4257_v49 = vld [vmem:[%s4641_s26 + $0x50] ss:$8 sps:$4 sm:$0xff]  }
 0x4cb   : > { %v4021_v54 = vpop.f32.mrf.mxu0  ;;  %v4026_v55 = vpop.f32.mrf.mxu1 }
 0x4cc   : > { %4045 = vmatmul.mubr.msk.bf16.vlgmr.msra.gmra.mxu0 %vm2030_vm2, %v2505_v52  ;;  %v4265_v52 = vld [vmem:[%s4641_s26 + $0x34] ss:$8 sps:$4 sm:$0xff]   ;;  %v4263_v54 = vld [vmem:[%s4641_s26 + $0x30] ss:$8 sps:$4 sm:$0xff]   ;;  %v4438_v55 = vmov 0  }
 0x4cd   : > { %v2407_v56 = vpop.f32.mrf.mxu1  ;;  %4057 = vmatpush3.bf16.msra.mxu0 %v4247_v51  ;;  %4060 = vmatprep.mubr.msk.bf16.mxu0 %vm4436_vm1, %v4435_v10  ;;  %v4262_v51 = vld [vmem:[%s4641_s26 + $0x44] ss:$8 sps:$4 sm:$0xff]  }
 0x4ce   : > { %v2506_v59 = vpack.c.bf16 %v2407_v56, %v2404_v50  ;;  %4058 = vmatprep.subr.bf16.mxu0 %v4435_v10  ;;  %v4260_v50 = vld [vmem:[%s4641_s26 + $0x40] ss:$8 sps:$4 sm:$0xff]   ;;  %v4268_v56 = vld [vmem:[%s4641_s26 + $0x24] ss:$8 sps:$4 sm:$0xff]  }
 0x4cf   : > { %v4027_v60 = vpop.f32.mrf.mxu1 }
 0x4d0   : > { %4053 = vmatmul.mubr.msk.bf16.vlgmr.msra.gmra.mxu1 %vm2030_vm2, %v2506_v59  ;;  %v4269_v59 = vld [vmem:[%s4641_s26 + $0x10] ss:$8 sps:$4 sm:$0xff]   ;;  %v4274_v60 = vld [vmem:[%s4641_s26 + $0x4] ss:$8 sps:$4 sm:$0xff]  }
 0x4d1   : > { %4059 = vmatpush3.bf16.msra.mxu0 %v4248_v57  ;;  %4065 = vmatpush3.bf16.msra.mxu1 %v4249_v58  ;;  %v4266_v57 = vld [vmem:[%s4641_s26 + $0x20] ss:$8 sps:$4 sm:$0xff]   ;;  %v4271_v58 = vld [vmem:[%s4641_s26 + $0x14] ss:$8 sps:$4 sm:$0xff]  }
 0x4d2   : > { %4066 = vmatprep.subr.bf16.mxu1 %v4435_v10  ;;  %4068 = vmatprep.mubr.msk.bf16.mxu1 %vm4436_vm1, %v4435_v10 }
 0x4d3   : > { %2925 = vmatprep.subr.bf16.mxu0 %v4253_v44 }
 0x4d5   : > { %4067 = vmatpush3.bf16.msra.mxu1 %v4250_v61  ;;  %v4272_v61 = vld [vmem:[%s4641_s26] ss:$8 sps:$4 sm:$0xff]  }
 0x4e5   : > { %v2451_v62 = vpop.f32.mrf.mxu0 }
 0x4e7   : > { %v4032_v63 = vpop.f32.mrf.mxu0 }
 0x4e9   : > { %v2454_v0 = vpop.f32.mrf.mxu0  ;;  %v2498_v1 = vpop.f32.mrf.mxu1 }
 0x4ea   : > { %v2507_v2 = vpack.c.bf16 %v2454_v0, %v2451_v62 }
 0x4eb   : > { %v4033_v3 = vpop.f32.mrf.mxu0  ;;  %v4038_v4 = vpop.f32.mrf.mxu1 }
 0x4ec   : > { %4061 = vmatmul.mubr.msk.bf16.vlgmr.msra.gmra.mxu0 %vm2030_vm2, %v2507_v2 }
 0x4ed   : > { %v2501_v5 = vpop.f32.mrf.mxu1  ;;  %2926 = vmatpush1.bf16.msra.mxu0 %v4251_v45  ;;  %2957 = vmatprep.mubr.bf16.mxu0 %v4438_v55  ;;  %v2833_v45 = vld [vmem:[%s4646_s15] sm:$0x3] }
 0x4ee   : > { %v2508_v6 = vpack.c.bf16 %v2501_v5, %v2498_v1  ;;  %2927 = vmatprep.subr.bf16.mxu0 %v4256_v46 }
 0x4ef   : > { %v4039_v7 = vpop.f32.mrf.mxu1 }
 0x4f0   : > { %4069 = vmatmul.mubr.msk.bf16.vlgmr.msra.gmra.mxu1 %vm2030_vm2, %v2508_v6 }
 0x4f1   : > { %2928 = vmatpush1.bf16.msra.mxu0 %v4254_v47 }
 0x4f2   : > { %2929 = vmatprep.subr.bf16.mxu0 %v4259_v48 }
 0x4f5   : > { %2930 = vmatpush1.bf16.msra.mxu0 %v4257_v49 }
 0x4f6   : > { %2931 = vmatprep.subr.bf16.mxu0 %v4262_v51 }
 0x4f9   : > { %2932 = vmatpush1.bf16.msra.mxu0 %v4260_v50 }
 0x4fa   : > { %2933 = vmatprep.subr.bf16.mxu0 %v4265_v52 }
 0x4fd   : > { %2934 = vmatpush1.bf16.msra.mxu0 %v4263_v54 }
 0x4fe   : > { %2935 = vmatprep.subr.bf16.mxu0 %v4268_v56 }
 0x501   : > { %2936 = vmatpush1.bf16.msra.mxu0 %v4266_v57 }
 0x502   : > { %2937 = vmatprep.subr.bf16.mxu0 %v4271_v58 }
 0x505   : > { %2938 = vmatpush1.bf16.msra.mxu0 %v4269_v59 }
 0x506   : > { %2939 = vmatprep.subr.bf16.mxu0 %v4274_v60 }
 0x509   : > { %2940 = vmatpush1.bf16.msra.mxu0 %v4272_v61 }
 0x58c   : > { %v2574_v8 = vpop.f32.mrf.mxu0 }
 0x58e   : > { %v4046_v9 = vpop.f32.mrf.mxu0 }
 0x590   : > { %v2577_v11 = vpop.f32.mrf.mxu0  ;;  %v2630_v12 = vpop.f32.mrf.mxu1 }
 0x591   : > { %v2749_v19 = vadd.f32 %v2630_v12, %v2574_v8  ;;  %v2752_v24 = vsel %vm713_vm0, %v2577_v11, 0.0 }
 0x592   : > { %v4047_v10 = vpop.f32.mrf.mxu0  ;;  %v4054_v15 = vpop.f32.mrf.mxu1 }
 0x594   : > { %v2633_v16 = vpop.f32.mrf.mxu1 }
 0x595   : > { %v2753_v20 = vsel %vm713_vm0, %v2633_v16, 0.0 }
 0x596   : > { %v4055_v17 = vpop.f32.mrf.mxu1  ;;  %v2754_v27 = vadd.f32 %v2753_v20, %v2752_v24 }
 0x597   : > { %v3548_v17 = vld [vmem:[%s5187_s17] ss:$0 sm:$0xff] }
 0x5ac   : > { %v2686_v18 = vpop.f32.mrf.mxu0 }
 0x5ad   : > { %v2750_v21 = vadd.f32 %v2749_v19, %v2686_v18 }
 0x5ae   : > { %v4062_v53 = vpop.f32.mrf.mxu0 }
 0x5b0   : > { %v2689_v22 = vpop.f32.mrf.mxu0  ;;  %v2742_v23 = vpop.f32.mrf.mxu1 }
 0x5b1   : > { %v2755_v25 = vsel %vm713_vm0, %v2689_v22, 0.0  ;;  %v2751_v26 = vadd.f32 %v2750_v21, %v2742_v23  ;;  %v3549_v21 = vld [vmem:[%s5188_s23] ss:$0 sm:$0xff] }
 0x5b2   : > { %v4063_v29 = vpop.f32.mrf.mxu0  ;;  %v4070_v30 = vpop.f32.mrf.mxu1  ;;  %v2756_v33 = vadd.f32 %v2755_v25, %v2754_v27  ;;  %v4276_v27 = vld [vmem:[%s4651_s0 + $0x38] sm:$0xff]  }
 0x5b3   : > { %v2759_v32 = vadd.f32 %v4339_v31, %v2751_v26  ;;  %v4275_v26 = vld [vmem:[%s4651_s0 + $0x78] sm:$0xff]   ;;  %v4278_v29 = vld [vmem:[%s4651_s0 + $0x30] sm:$0xff]   ;;  %v4279_v30 = vld [vmem:[%s4651_s0 + $0x68] sm:$0xff]  }
 0x5b4   : > { %v2745_v13 = vpop.f32.mrf.mxu1  ;;  %3730 = vmatprep.subr.bf16.mxu1 %v4275_v26  ;;  %v4280_v31 = vld [vmem:[%s4651_s0 + $0x28] sm:$0xff]  }
 0x5b5   : > { %v5010_v34 = vadd.f32 %v3547_v28, %v2759_v32  ;;  %v2757_v35 = vsel %vm713_vm0, %v2745_v13, 0.0  ;;  %3731 = vmatpush3.bf16.msra.mxu1 %v4276_v27  ;;  %v4281_v32 = vld [vmem:[%s4651_s0 + $0x60] sm:$0xff]   ;;  %v4283_v13 = vld [vmem:[%s4651_s0 + $0x58] sm:$0xff]  }
 0x5b6   : > { %v2758_v36 = vadd.f32 %v2757_v35, %v2756_v33  ;;  %v4071_v14 = vpop.f32.mrf.mxu1  ;;  %v4282_v33 = vld [vmem:[%s4651_s0 + $0x20] sm:$0xff]   ;;  %v4284_v35 = vld [vmem:[%s4651_s0 + $0x18] sm:$0xff]  }
 0x5b7   : > { %2772 = vadd.xlane.f32.xlu0 %v5010_v34  ;;  %v2779_v39 = vmul.f32 %v5010_v34, %v5010_v34  ;;  %v4286_v14 = vld [vmem:[%s4651_s0 + $0x10] sm:$0xff]  }
 0x5b8   : > { %v2760_v38 = vadd.f32 %v4340_v37, %v2758_v36  ;;  %v4285_v36 = vld [vmem:[%s4651_s0 + $0x50] sm:$0xff]   ;;  %v4287_v37 = vld [vmem:[%s4651_s0 + $0x48] sm:$0xff]  }
 0x5ba   : > { %v5016_v40 = vadd.f32 %v3547_v28, %v2760_v38  ;;  %v4277_v28 = vld [vmem:[%s4651_s0 + $0x70] sm:$0xff]   ;;  %v4288_v38 = vld [vmem:[%s4651_s0 + $0x8] sm:$0xff]  }
 0x5bb   : > { %2781 = vadd.xlane.f32.xlu0 %v2779_v39  ;;  %3732 = vmatprep.subr.bf16.mxu1 %v4277_v28  ;;  %v4289_v39 = vld [vmem:[%s4651_s0 + $0x40] sm:$0xff]  }
 0x5bc   : > { %v2774_v41 = vsel %vm713_vm0, %v5016_v40, 0.0  ;;  %v2780_v42 = vmul.f32 %v5016_v40, %v5016_v40  ;;  %3733 = vmatpush3.bf16.msra.mxu1 %v4278_v29 }
 0x5bd   : > { %2775 = vadd.xlane.f32.xlu1 %v2774_v41  ;;  %3734 = vmatprep.subr.bf16.mxu1 %v4279_v30  ;;  %v4290_v41 = vld [vmem:[%s4651_s0] sm:$0xff]  }
 0x5be   : > { %v2783_v43 = vsel %vm713_vm0, %v2780_v42, 0.0  ;;  %v2835_v42 = vlaneseq }
 0x5c0   : > { %3735 = vmatpush3.bf16.msra.mxu1 %v4280_v31 }
 0x5c1   : > { %2784 = vadd.xlane.f32.xlu1 %v2783_v43  ;;  %3736 = vmatprep.subr.bf16.mxu1 %v4281_v32  ;;  %v2836_v43 = vshrl.u32 %v2835_v42, 7 }
 0x5c3   : > { %v2837_v44 = vsub.s32 0, %v2836_v43  ;;  %v2841_v46 = vsub.s32 1, %v2836_v43 }
 0x5c4   : > { %3737 = vmatpush3.bf16.msra.mxu1 %v4282_v33 }
 0x5c5   : > { %3738 = vmatprep.subr.bf16.mxu1 %v4283_v13  ;;  %v2838_v47 = vrot.slane %v2833_v45, %v2837_v44  ;;  %v2842_v48 = vrot.slane %v2833_v45, %v2841_v46  ;;  %v3566_v13 = vld [vmem:[%s697_s27] ss:$0 sm:$0xff] }
 0x5c8   : > { %3739 = vmatpush3.bf16.msra.mxu1 %v4284_v35 }
 0x5c9   : > { %3740 = vmatprep.subr.bf16.mxu1 %v4285_v36 }
 0x5cc   : > { %3741 = vmatpush3.bf16.msra.mxu1 %v4286_v14 }
 0x5cd   : > { %3742 = vmatprep.subr.bf16.mxu1 %v4287_v37 }
 0x5d0   : > { %3743 = vmatpush3.bf16.msra.mxu1 %v4288_v38 }
 0x5d1   : > { %3744 = vmatprep.subr.bf16.mxu1 %v4289_v39 }
 0x5d4   : > { %3745 = vmatpush3.bf16.msra.mxu1 %v4290_v41 }
 0x640   : > { %v2773_v62 = vpop.xlane.xlu0 %2772 }
 0x641   : > { %v2777_v63 = vmul.f32 0.0078125, %v2773_v62 }
 0x643   : > { %v2788_v1 = vmul.f32 %v2777_v63, %v2777_v63  ;;  %v2792_v15 = vsub.f32 %v5010_v34, %v2777_v63 }
 0x644   : > { %v2782_v0 = vpop.xlane.xlu0 %2781 }
 0x645   : > { %v2786_v2 = vmul.f32 0.0078125, %v2782_v0 }
 0x646   : > { %v2776_v3 = vpop.xlane.xlu1 %2775 }
 0x647   : > { %v2790_v4 = vsub.f32 %v2786_v2, %v2788_v1  ;;  %v2778_v5 = vmul.f32 0.0078125, %v2776_v3 }
 0x649   : > { %v2794_v6 = vadd.f32 1e-05, %v2790_v4  ;;  %v2789_v8 = vmul.f32 %v2778_v5, %v2778_v5  ;;  %v2793_v18 = vsub.f32 %v5016_v40, %v2778_v5 }
 0x64a   : > { %v2785_v7 = vpop.xlane.xlu1 %2784 }
 0x64b   : > { %4327 = vrsqrt.f32 %v2794_v6  ;;  %v2787_v9 = vmul.f32 0.0078125, %v2785_v7 }
 0x64d   : > { %v2791_v11 = vsub.f32 %v2787_v9, %v2789_v8 }
 0x64f   : > { %v2795_v12 = vadd.f32 1e-05, %v2791_v11 }
 0x651   : > { %4329 = vrsqrt.f32 %v2795_v12 }
 0x658   : > { %v4328_v10 = vpop.eup %4327 }
 0x659   : > { %v2798_v16 = vmul.f32 %v4328_v10, %v2792_v15 }
 0x65b   : > { %v2806_v20 = vmul.f32 %v3548_v17, %v2798_v16 }
 0x65d   : > { %v2814_v23 = vadd.f32 %v3549_v21, %v2806_v20 }
 0x65e   : > { %v4330_v19 = vpop.eup %4329 }
 0x65f   : > { %v2799_v53 = vmul.f32 %v4330_v19, %v2793_v18 }
 0x661   : > { %v2807_v22 = vmul.f32 %v3548_v17, %v2799_v53 }
 0x663   : > { %v2815_v24 = vadd.f32 %v3549_v21, %v2807_v22 }
 0x665   : > { %v2816_v25 = vpack.c.bf16 %v2815_v24, %v2814_v23 }
 0x667   : > { %2958 = vmatmul.mubr.bf16.vlgmr.msra.gmra.mxu0 %v2816_v25 }
 0x727   : > { %v2959_v49 = vpop.f32.mrf.mxu0 }
 0x728   : > { %v2960_v50 = vadd.f32 %v2959_v49, %v2838_v47 }
 0x729   : > { %v2961_v51 = vpop.f32.mrf.mxu0 }
 0x72a   : > { %v2972_v52 = vmul.f32 0.044715, %v2960_v50  ;;  %v2962_v54 = vadd.f32 %v2961_v51, %v2842_v48  ;;  %v2968_v26 = vmul.f32 0.5, %v2960_v50 }
 0x72b   : > { %v2963_v55 = vpop.f32.mrf.mxu0 }
 0x72c   : > { %v2976_v56 = vmul.f32 %v2972_v52, %v2960_v50  ;;  %v2973_v57 = vmul.f32 0.044715, %v2962_v54  ;;  %v2964_v58 = vadd.f32 %v2963_v55, %v2838_v47  ;;  %v2969_v23 = vmul.f32 0.5, %v2962_v54 }
 0x72d   : > { %v2965_v59 = vpop.f32.mrf.mxu0 }
 0x72e   : > { %v2980_v60 = vmul.f32 %v2976_v56, %v2960_v50  ;;  %v2977_v61 = vmul.f32 %v2973_v57, %v2962_v54  ;;  %v2974_v62 = vmul.f32 0.044715, %v2964_v58  ;;  %v2966_v63 = vadd.f32 %v2965_v59, %v2842_v48 }
 0x72f   : > { %v2970_v21 = vmul.f32 0.5, %v2964_v58 }
 0x730   : > { %v2984_v0 = vadd.f32 %v2980_v60, %v2960_v50  ;;  %v2981_v1 = vmul.f32 %v2977_v61, %v2962_v54  ;;  %v2978_v2 = vmul.f32 %v2974_v62, %v2964_v58  ;;  %v2975_v3 = vmul.f32 0.044715, %v2966_v63 }
 0x731   : > { %v2971_v24 = vmul.f32 0.5, %v2966_v63 }
 0x732   : > { %v2982_v4 = vmul.f32 %v2978_v2, %v2964_v58  ;;  %v2979_v5 = vmul.f32 %v2975_v3, %v2966_v63  ;;  %v2985_v6 = vadd.f32 %v2981_v1, %v2962_v54  ;;  %v2988_v7 = vmul.f32 0.7978846, %v2984_v0 }
 0x734   : > { %v2986_v8 = vadd.f32 %v2982_v4, %v2964_v58  ;;  %v2983_v9 = vmul.f32 %v2979_v5, %v2966_v63  ;;  %v2989_v11 = vmul.f32 0.7978846, %v2985_v6 }
 0x736   : > { %v2990_v12 = vmul.f32 0.7978846, %v2986_v8  ;;  %v2987_v10 = vadd.f32 %v2983_v9, %v2966_v63  ;;  %4331 = vtanh.f32 %v2989_v11 }
 0x737   : > { %4333 = vtanh.f32 %v2988_v7 }
 0x738   : > { %4335 = vtanh.f32 %v2990_v12  ;;  %v2991_v15 = vmul.f32 0.7978846, %v2987_v10 }
 0x73a   : > { %4337 = vtanh.f32 %v2991_v15 }
 0x743   : > { %v4332_v16 = vpop.eup %4331 }
 0x744   : > { %v4334_v17 = vpop.eup %4333  ;;  %v2997_v19 = vadd.f32 1.0, %v4332_v16 }
 0x745   : > { %v4336_v18 = vpop.eup %4335  ;;  %v2996_v22 = vadd.f32 1.0, %v4334_v17 }
 0x746   : > { %v2998_v53 = vadd.f32 1.0, %v4336_v18  ;;  %v3001_v28 = vmul.f32 %v2997_v19, %v2969_v23 }
 0x747   : > { %v4338_v20 = vpop.eup %4337  ;;  %v3000_v30 = vmul.f32 %v2996_v22, %v2968_v26 }
 0x748   : > { %v2999_v25 = vadd.f32 1.0, %v4338_v20  ;;  %v3002_v27 = vmul.f32 %v2998_v53, %v2970_v21 }
 0x74a   : > { %v3003_v29 = vmul.f32 %v2999_v25, %v2971_v24  ;;  %v3004_v32 = vpack.c.bf16 %v3002_v27, %v3000_v30 }
 0x74c   : > { %v3005_v31 = vpack.c.bf16 %v3003_v29, %v3001_v28 }
 0x74e   : > { %3173 = vmatprep.mubr.bf16.mxu1 %v3005_v31 }
 0x74f   : > { %3174 = vmatmul.mubr.bf16.vlgmr.msra.gmra.mxu1 %v3004_v32 }
 0x80f   : > { %v3746_v33 = vpop.f32.mrf.mxu1 }
 0x811   : > { %v3747_v35 = vpop.f32.mrf.mxu1 }
 0x812   : > { %v3748_v36 = vadd.f32 %v3747_v35, %v3746_v33 }
 0x813   : > { %v3749_v14 = vpop.f32.mrf.mxu1 }
 0x814   : > { %v3176_v37 = vadd.f32 %v3748_v36, %v3566_v13 }
 0x815   : > { %v3750_v38 = vpop.f32.mrf.mxu1 }
 0x816   : > { %v3182_v39 = vadd.f32 %v3176_v37, %v5010_v34  ;;  %v3751_v41 = vadd.f32 %v3750_v38, %v3749_v14 }
 0x818   : > { %3184 = vst [vmem:[#allocation2] sm:$0xff] %v3182_v39  ;;  %v3179_v42 = vadd.f32 %v3751_v41, %v3566_v13  ;;  %3189 = sbr.rel (%p3583_p1) target bundleno = 2078 (0x81e), region = 84 }
 0x81a   : > { %v3183_v43 = vadd.f32 %v3179_v42, %v5016_v40 }
 0x81c   : > { %3185 = vst [vmem:[#allocation2 + $0x8] sm:$0x1] %v3183_v43 }
 0x81d   : > { %3190 = vst [vmem:[%s4659_s6] sm:$0x1] %v3182_v39 }
 0x81e PF: > { %s5191_s18 = sld [smem:[#allocation9_spill]]  ;;  %s3204_s16 = sshll.u32 %s4659_s6, 4  ;;  %s3205_s16 = int_to_ptr.vmem [resolvable:$true] %s3204_s16 }
 0x81f   : > { %s5193_s14 = sld [smem:[#allocation25_spill]]  ;;  %s5194_s20 = sand.u32 1, %s4409_s30  }
 0x820   : > { %s3192_s24 = scalar_lea.sflag [#allocation4], %s5194_s20  ;;  %s4341_s29 = scalar_lea.vmem %s3205_s16, 16 }
 0x821   : > { %p4342_p2 = scmp.ne.s32.totalorder %s3205_s16, %s4341_s29  ;;  %s4439_s26 = smov [#allocation3]  }
 0x822   : > { %s4345_s28 = sshll.u32 %s4439_s26, 4  ;;  %s4346_s28 = int_to_ptr.vmem [resolvable:$false] %s4345_s28 }
 0x823   : > { %p4343_p4 = pnand %p4342_p2, %p4564_p3  ;;  %s4347_s17 = scalar_lea.vmem %s4346_s28, 32 }
 0x824   : > { %s3584_s22 = sshll.u32 %s5191_s18, 4  ;;  %p4348_p6 = scmp.lt.s32.totalorder %s3205_s16, %s4346_s28 }
 0x825   : > { %s3202_s21 = scalar_lea.hbm %s5193_s14, %s3584_s22  ;;  %p4344_p5 = pneg %p4343_p4 }
 0x826   : > { %p4349_p7 = scmp.lt.s32.totalorder %s4347_s17, %s4341_s29 }
 0x828   : > { %p4350_p8 = por %p4349_p7, %p4348_p6 }
 0x82a   : > { %p4351_p10 = pnand %p4350_p8, %p4344_p5 }
 0x82c   : > { %4354 = shalt.err (!%p4351_p10)
}
 0x82d   : > { %s4355_s3 = scalar_lea.hbm %s3202_s21, 16  ;;  %s4359_s23 = scalar_lea.hbm %s5193_s14, 32 }
 0x82e   : > { %p4356_p11 = scmp.ne.s32.totalorder %s3202_s21, %s4355_s3  ;;  %p4360_p0 = scmp.lt.s32.totalorder %s3202_s21, %s5193_s14 }
 0x82f   : > { %p4361_p1 = scmp.lt.s32.totalorder %s4359_s23, %s4355_s3 }
 0x830   : > { %p4357_p12 = pnand %p4356_p11, %p4564_p3 }
 0x831   : > { %p4362_p2 = por %p4361_p1, %p4360_p0 }
 0x832   : > { %p4358_p13 = pneg %p4357_p12 }
 0x834   : > { %p4363_p4 = pnand %p4362_p2, %p4358_p13 }
 0x836   : > { %4366 = shalt.err (!%p4363_p4)
}
 0x837   : > { %4072 = dma.vmem_to_hbm [thread:$0]  (%p4564_p3), %s3205_s16, 16, %s3202_s21, %s3192_s24  }
 0x838 PF: > { %s5195_s5 = sld [smem:[#allocation12_spill]] }
 0x839   : > { %s5196_s19 = sld [smem:[#allocation6_spill]] }
 0x83e   : > { %p4078_p5 = scmp.ge.s32.totalorder %s5195_s5, 2 }
 0x83f   : > { %s3216_s22 = sand.u32 1, %s5196_s19  }
 0x840   : > { %p4075_p6 = pnand %p4078_p5, %p4574_p9  ;;  %s3217_s25 = scalar_lea.sflag [#allocation4], %s3216_s22 }
 0x842   : > { %p4076_p7 = pneg %p4075_p6 }
 0x844   : > { %4400 = dma.done.wait (%p4076_p7), %s3217_s25, 16  }
 0x845   : > { %4402 = vsyncadd (%p4076_p7), %s3217_s25, 4294967280  ;;  %s27_s20 = sadd.s32 1, %s5195_s5   ;;  %s5198_s13 = sld [smem:[#allocation7_spill]] }
 0x846   : > { %p24_p8 = scmp.ge.s32.totalorder %s27_s20, 6   ;;  %s5199_s15 = sld [smem:[#allocation17_spill]] }
 0x847   : > { %s5200_s16 = sld [smem:[#allocation10_spill]]  ;;  %s5204_s29 = smov %s4409_s30 }
 0x848   : > { %s5201_s17 = sld [smem:[#allocation11_spill]]  ;;  %26 = sbr.rel (!%p24_p8) target bundleno = 13 (0xd), region = 158 }
 0x849   : > { %s5202_s18 = sld [smem:[#allocation13_spill]] }
 0x84a   : > { %s5203_s19 = sld [smem:[#allocation15_spill]] }
 0x84b   : > { %s5205_s30 = smov %s5198_s13 }
 0x84d   :  { %3221 = vsyncpa [#allocation4], 1 }
 0x84e   :  { %3223 = vsyncpa [#allocation4 + $0x1], 1 }

</bundles_post_ra>
